<compile_context>
chip_gen: v5e
topology: v5e:2x2
jax: 0.10.0
libtpu: 0.0.40
codegen_flags: <defaults>
</compile_context>

<pallas_src>
import functools

import jax
import jax.numpy as jnp
from jax.experimental import pallas as pl
from jax.experimental.pallas import tpu as pltpu

K_IN = 28 * 28      # 784 (PyTorch flatten size)
HID = 512
N_OUT = 10
N_PAD = 128         # lane-dense logits width


def mlp_kernel(x_ref, w1_ref, b1_ref, w2_ref, b2_ref, w3_ref, b3_ref, o_ref):
    """Fused 3-layer MLP forward on one (TILE_B, 784) batch tile.

    x_ref : (TILE_B, 784) f32   (cast to bf16 on the VPU, hidden under the MXU)
    w1    : (784, 512) bf16     b1: (1, 512) f32
    w2    : (512, 512) bf16     b2: (1, 512) f32
    w3    : (512, 128) bf16     b3: (1, 128) f32   (cols 10..127 zero-padded)
    o_ref : (TILE_B, 128) f32
    """
    x = x_ref[...].astype(jnp.bfloat16)

    # Layer 1: Linear(784 -> 512) + ReLU   (bf16 MXU operands, f32 accumulate)
    h1 = jnp.dot(x, w1_ref[...], preferred_element_type=jnp.float32) + b1_ref[...]
    h1 = jnp.maximum(h1, 0.0).astype(jnp.bfloat16)

    # Layer 2: Linear(512 -> 512) + ReLU
    h2 = jnp.dot(h1, w2_ref[...], preferred_element_type=jnp.float32) + b2_ref[...]
    h2 = jnp.maximum(h2, 0.0).astype(jnp.bfloat16)

    # Layer 3: Linear(512 -> 128_padded) — logits, no activation, lane-dense store
    o_ref[...] = (
        jnp.dot(h2, w3_ref[...], preferred_element_type=jnp.float32) + b3_ref[...]
    ).astype(o_ref.dtype)


def _round_up(x, m):
    return (x + m - 1) // m * m


def _choose_tile(batch, tile_b):
    """Clamp the batch tile: multiple of 8 (sublane rule), capped at the padded
    batch, and split into >= 2 grid steps when possible (v7x megacore)."""
    tile_b = max(8, _round_up(min(tile_b, _round_up(batch, 8)), 8))
    b_pad = _round_up(batch, tile_b)
    if b_pad // tile_b == 1 and b_pad >= 16:
        tile_b = _round_up(b_pad // 2, 8)
        b_pad = _round_up(batch, tile_b)
    return tile_b, b_pad


def prepare_params(params):
    """One-time weight prep, hoisted off the per-call forward path:
    cast weights to bf16 for the MXU and pad layer-3 out dim 10 -> 128 so the
    final matmul/store is a full unmasked lane-dense block."""
    w1, b1, w2, b2, w3, b3 = params
    w1_p = w1.astype(jnp.bfloat16)                                          # (784, 512)
    w2_p = w2.astype(jnp.bfloat16)                                          # (512, 512)
    w3_p = jnp.pad(w3, ((0, 0), (0, N_PAD - N_OUT))).astype(jnp.bfloat16)   # (512, 128)
    b1_p = b1.astype(jnp.float32)                                           # (1, 512)
    b2_p = b2.astype(jnp.float32)                                           # (1, 512)
    b3_p = jnp.pad(b3, ((0, 0), (0, N_PAD - N_OUT))).astype(jnp.float32)    # (1, 128)
    return (w1_p, b1_p, w2_p, b2_p, w3_p, b3_p)


@functools.partial(jax.jit, static_argnames=("tile_b",))
def neural_network_forward(x_nchw, prepared_params, *, tile_b=1024):
    """x_nchw: (B, 1, 28, 28) float32 (PyTorch NCHW). Returns logits (B, 10) f32.
    `prepared_params` must come from `prepare_params()` (bf16, padded)."""
    w1, b1, w2, b2, w3, b3 = prepared_params
    B = x_nchw.shape[0]

    # nn.Flatten(): flatten all dims after batch, row-major (matches PyTorch).
    x_flat = x_nchw.reshape(B, -1)                                    # (B, 784), free

    tile_b, b_pad = _choose_tile(B, tile_b)
    n_tiles = b_pad // tile_b

    # Only pad the batch rows; keep f32 and the native 784 feature dim so the
    # kernel consumes x directly (no extra HBM pass for a pad/cast round-trip).
    x_p = jnp.pad(x_flat, ((0, b_pad - B), (0, 0)))

    resident = lambda a: pl.BlockSpec(a.shape, lambda i: (0,) * a.ndim)

    flops = 2 * b_pad * (K_IN * HID + HID * HID + HID * N_PAD)
    bytes_accessed = (
        x_p.size * 4                                # f32 activations in
        + (w1.size + w2.size + w3.size) * 2         # bf16 weights
        + (b1.size + b2.size + b3.size) * 4         # f32 biases
        + b_pad * N_PAD * 4                         # f32 logits out
    )

    out_padded = pl.pallas_call(
        mlp_kernel,
        out_shape=jax.ShapeDtypeStruct((b_pad, N_PAD), jnp.float32),
        grid=(n_tiles,),
        in_specs=[
            pl.BlockSpec((tile_b, K_IN), lambda i: (i, 0)),   # x tile (pipelined)
            resident(w1), resident(b1),                       # weights stay in VMEM
            resident(w2), resident(b2),
            resident(w3), resident(b3),
        ],
        out_specs=pl.BlockSpec((tile_b, N_PAD), lambda i: (i, 0)),
        compiler_params=pltpu.CompilerParams(
            dimension_semantics=("parallel",),     # megacore shard on v7x
            vmem_limit_bytes=32 << 20,             # headroom for 1024-row tiles
        ),
        cost_estimate=pl.CostEstimate(
            flops=flops, transcendentals=0, bytes_accessed=bytes_accessed
        ),
    )(x_p, w1, b1, w2, b2, w3, b3)

    return out_padded[:B, :N_OUT]


def init_params(key):
    """Deterministic init mimicking PyTorch nn.Linear default:
    U(-1/sqrt(fan_in), 1/sqrt(fan_in)) for weight and bias. Weights are stored
    transposed relative to PyTorch ((in, out) instead of (out, in)) so the
    kernel does x @ W directly. Biases are (1, out)."""
    dims = [(K_IN, HID), (HID, HID), (HID, N_OUT)]
    params = []
    for (fan_in, fan_out) in dims:
        key, kw, kb = jax.random.split(key, 3)
        bound = 1.0 / jnp.sqrt(jnp.float32(fan_in))
        w = jax.random.uniform(kw, (fan_in, fan_out), jnp.float32, -bound, bound)
        b = jax.random.uniform(kb, (1, fan_out), jnp.float32, -bound, bound)
        params += [w, b]
    return tuple(params)


if __name__ == "__main__":
    key = jax.random.PRNGKey(0)
    key, kx = jax.random.split(key)

    # Small MNIST-like batch: (B=16, C=1, H=28, W=28), NCHW like PyTorch.
    B = 16
    x = jax.random.normal(kx, (B, 1, 28, 28), dtype=jnp.float32)
    params = init_params(key)

    # One-time weight prep (off the per-call hot path).
    prepared = prepare_params(params)

    # Default tile_b: the clamp logic shrinks it to the batch and still splits
    # the launch into 2 grid steps, exercising the pipelined / megacore path.
    logits = neural_network_forward(x, prepared)
    jax.block_until_ready(logits)

    # Pure-JAX f32 reference (PyTorch semantics). Kernel uses bf16 matmul
    # operands with f32 accumulation, so compare with a loosened tolerance.
    w1, b1, w2, b2, w3, b3 = params
    xf = x.reshape(B, -1)
    ref = jnp.maximum(xf @ w1 + b1, 0.0)
    ref = jnp.maximum(ref @ w2 + b2, 0.0)
    ref = ref @ w3 + b3

    assert logits.shape == (B, N_OUT), logits.shape
    assert jnp.allclose(logits, ref, atol=2e-2, rtol=2e-2), (
        float(jnp.max(jnp.abs(logits - ref)))
    )

    print("KERNEL_OK")
</pallas_src>

<mosaic_0001>
module attributes {stable_mosaic.version = 11 : i64} {
  func.func @mlp_kernel(%arg0: i32, %arg1: memref<8x784xf32, #tpu.memory_space<vmem>>, %arg2: memref<784x512xbf16, #tpu.memory_space<vmem>>, %arg3: memref<1x512xf32, #tpu.memory_space<vmem>>, %arg4: memref<512x512xbf16, #tpu.memory_space<vmem>>, %arg5: memref<1x512xf32, #tpu.memory_space<vmem>>, %arg6: memref<512x128xbf16, #tpu.memory_space<vmem>>, %arg7: memref<1x128xf32, #tpu.memory_space<vmem>>, %arg8: memref<8x128xf32, #tpu.memory_space<vmem>>) attributes {dimension_semantics = [#tpu.dimension_semantics<parallel>], iteration_bounds = array<i64: 2>, scalar_prefetch = 0 : i64, scratch_operands = 0 : i64, tpu.core_type = #tpu.core_type<tc>, window_params = [{transform_indices = @transform_0, window_bounds = array<i64: 8, 784>}, {pipeline_mode = #tpu.pipeline_mode<synchronous>, transform_indices = @transform_1, window_bounds = array<i64: 784, 512>}, {pipeline_mode = #tpu.pipeline_mode<synchronous>, transform_indices = @transform_2, window_bounds = array<i64: 1, 512>}, {pipeline_mode = #tpu.pipeline_mode<synchronous>, transform_indices = @transform_3, window_bounds = array<i64: 512, 512>}, {pipeline_mode = #tpu.pipeline_mode<synchronous>, transform_indices = @transform_4, window_bounds = array<i64: 1, 512>}, {pipeline_mode = #tpu.pipeline_mode<synchronous>, transform_indices = @transform_5, window_bounds = array<i64: 512, 128>}, {pipeline_mode = #tpu.pipeline_mode<synchronous>, transform_indices = @transform_6, window_bounds = array<i64: 1, 128>}, {transform_indices = @transform_7, window_bounds = array<i64: 8, 128>}]} {
    %c0 = arith.constant 0 : index
    %c0_0 = arith.constant 0 : index
    %0 = vector.load %arg1[%c0, %c0_0] : memref<8x784xf32, #tpu.memory_space<vmem>>, vector<8x784xf32>
    %1 = arith.truncf %0 : vector<8x784xf32> to vector<8x784xbf16>
    %c0_1 = arith.constant 0 : index
    %c0_2 = arith.constant 0 : index
    %2 = vector.load %arg2[%c0_1, %c0_2] : memref<784x512xbf16, #tpu.memory_space<vmem>>, vector<784x512xbf16>
    %cst = arith.constant dense<0.000000e+00> : vector<8x512xf32>
    %3 = tpu.matmul %1, %2, %cst {dimension_numbers = #tpu.dot_dimension_numbers<[1], [0], [0], [1], [0, 0, 1, 1], [], []>} : vector<8x784xbf16>, vector<784x512xbf16>, vector<8x512xf32> -> vector<8x512xf32>
    %c0_3 = arith.constant 0 : index
    %c0_4 = arith.constant 0 : index
    %4 = vector.load %arg3[%c0_3, %c0_4] : memref<1x512xf32, #tpu.memory_space<vmem>>, vector<1x512xf32>
    %5 = vector.broadcast %4 : vector<1x512xf32> to vector<8x512xf32>
    %6 = arith.addf %3, %5 : vector<8x512xf32>
    %cst_5 = arith.constant 0.000000e+00 : f32
    %7 = vector.broadcast %cst_5 : f32 to vector<8x512xf32>
    %8 = arith.maximumf %6, %7 : vector<8x512xf32>
    %9 = arith.truncf %8 : vector<8x512xf32> to vector<8x512xbf16>
    %c0_6 = arith.constant 0 : index
    %c0_7 = arith.constant 0 : index
    %10 = vector.load %arg4[%c0_6, %c0_7] : memref<512x512xbf16, #tpu.memory_space<vmem>>, vector<512x512xbf16>
    %cst_8 = arith.constant dense<0.000000e+00> : vector<8x512xf32>
    %11 = tpu.matmul %9, %10, %cst_8 {dimension_numbers = #tpu.dot_dimension_numbers<[1], [0], [0], [1], [0, 0, 1, 1], [], []>} : vector<8x512xbf16>, vector<512x512xbf16>, vector<8x512xf32> -> vector<8x512xf32>
    %c0_9 = arith.constant 0 : index
    %c0_10 = arith.constant 0 : index
    %12 = vector.load %arg5[%c0_9, %c0_10] : memref<1x512xf32, #tpu.memory_space<vmem>>, vector<1x512xf32>
    %13 = vector.broadcast %12 : vector<1x512xf32> to vector<8x512xf32>
    %14 = arith.addf %11, %13 : vector<8x512xf32>
    %cst_11 = arith.constant 0.000000e+00 : f32
    %15 = vector.broadcast %cst_11 : f32 to vector<8x512xf32>
    %16 = arith.maximumf %14, %15 : vector<8x512xf32>
    %17 = arith.truncf %16 : vector<8x512xf32> to vector<8x512xbf16>
    %c0_12 = arith.constant 0 : index
    %c0_13 = arith.constant 0 : index
    %18 = vector.load %arg6[%c0_12, %c0_13] : memref<512x128xbf16, #tpu.memory_space<vmem>>, vector<512x128xbf16>
    %cst_14 = arith.constant dense<0.000000e+00> : vector<8x128xf32>
    %19 = tpu.matmul %17, %18, %cst_14 {dimension_numbers = #tpu.dot_dimension_numbers<[1], [0], [0], [1], [0, 0, 1, 1], [], []>} : vector<8x512xbf16>, vector<512x128xbf16>, vector<8x128xf32> -> vector<8x128xf32>
    %c0_15 = arith.constant 0 : index
    %c0_16 = arith.constant 0 : index
    %20 = vector.load %arg7[%c0_15, %c0_16] : memref<1x128xf32, #tpu.memory_space<vmem>>, vector<1x128xf32>
    %21 = vector.broadcast %20 : vector<1x128xf32> to vector<8x128xf32>
    %22 = arith.addf %19, %21 : vector<8x128xf32>
    %c0_17 = arith.constant 0 : index
    %c0_18 = arith.constant 0 : index
    %23 = vector.load %arg8[%c0_17, %c0_18] : memref<8x128xf32, #tpu.memory_space<vmem>>, vector<8x128xf32>
    tpu.vector_store %arg8[%c0_17, %c0_18], %22 {strides = array<i32>} : memref<8x128xf32, #tpu.memory_space<vmem>>, vector<8x128xf32>,
    return
  }
  func.func @transform_0(%arg0: i32) -> (i32, i32) {
    %c0_i32 = arith.constant 0 : i32
    %c0_i32_0 = arith.constant 0 : i32
    return %arg0, %c0_i32 : i32, i32
  }
  func.func @transform_1(%arg0: i32) -> (i32, i32) {
    %c0_i32 = arith.constant 0 : i32
    %c0_i32_0 = arith.constant 0 : i32
    %c0_i32_1 = arith.constant 0 : i32
    return %c0_i32, %c0_i32_0 : i32, i32
  }
  func.func @transform_2(%arg0: i32) -> (i32, i32) {
    %c0_i32 = arith.constant 0 : i32
    %c0_i32_0 = arith.constant 0 : i32
    %c0_i32_1 = arith.constant 0 : i32
    return %c0_i32, %c0_i32_0 : i32, i32
  }
  func.func @transform_3(%arg0: i32) -> (i32, i32) {
    %c0_i32 = arith.constant 0 : i32
    %c0_i32_0 = arith.constant 0 : i32
    %c0_i32_1 = arith.constant 0 : i32
    return %c0_i32, %c0_i32_0 : i32, i32
  }
  func.func @transform_4(%arg0: i32) -> (i32, i32) {
    %c0_i32 = arith.constant 0 : i32
    %c0_i32_0 = arith.constant 0 : i32
    %c0_i32_1 = arith.constant 0 : i32
    return %c0_i32, %c0_i32_0 : i32, i32
  }
  func.func @transform_5(%arg0: i32) -> (i32, i32) {
    %c0_i32 = arith.constant 0 : i32
    %c0_i32_0 = arith.constant 0 : i32
    %c0_i32_1 = arith.constant 0 : i32
    return %c0_i32, %c0_i32_0 : i32, i32
  }
  func.func @transform_6(%arg0: i32) -> (i32, i32) {
    %c0_i32 = arith.constant 0 : i32
    %c0_i32_0 = arith.constant 0 : i32
    %c0_i32_1 = arith.constant 0 : i32
    return %c0_i32, %c0_i32_0 : i32, i32
  }
  func.func @transform_7(%arg0: i32) -> (i32, i32) {
    %c0_i32 = arith.constant 0 : i32
    %c0_i32_0 = arith.constant 0 : i32
    return %arg0, %c0_i32 : i32, i32
  }
}

</mosaic_0001>

<bundles_post_ra>
// kernel: neural_network_forward.1
= control target key start
LH: loop header
LB: loop body
LE: loop exit
PB: predicated region body
PF: predicated region fallthrough
CT: control target
= control target key end

     0   :  { %12 = vsyncpa [#allocation3], 0  ;;  %s6776_s0 = inlined_call_operand.vmem [shape: f32[16,784], index: 0, kind: input, shape index: {}]   ;;  %s6777_s1 = inlined_call_operand.vmem [shape: bf16[784,512], index: 1, kind: input, shape index: {}]   ;;  %s6778_s2 = inlined_call_operand.vmem [shape: f32[1,512], index: 2, kind: input, shape index: {}]   ;;  %s6779_s3 = inlined_call_operand.hbm [shape: bf16[512,512], index: 3, kind: input, shape index: {}]   ;;  %s6780_s4 = inlined_call_operand.vmem [shape: f32[1,512], index: 4, kind: input, shape index: {}]   ;;  %s6781_s5 = inlined_call_operand.hbm [shape: bf16[512,128], index: 5, kind: input, shape index: {}]   ;;  %s6782_s6 = inlined_call_operand.vmem [shape: f32[1,128], index: 6, kind: input, shape index: {}]   ;;  %s6783_s7 = inlined_call_operand.hbm [shape: f32[16,128], index: 7, kind: output, shape index: {}]  }
   0x1   :  { %13 = vsyncpa [#allocation6], 0 }
   0x2   :  { %14 = vsyncpa [#allocation4], 0 }
   0x3   :  { %16 = vsyncpa [#allocation4 + $0x1], 0  ;;  %s5334_s24 = smov 0   ;;  %s5336_s25 = smov 0  }
   0x4   :  { %s5338_s26 = smov 0   ;;  %s5340_s27 = smov 0  }
   0x5 LB: > { %s5355_s28 = sadd.s32 4294967295, %s5286_s27   ;;  %s3292_s29 = sadd.s32 4294967294, %s5286_s27   ;;  %s5286_s27 = sphi %s5340_s27, %s6790_s27   ;;  %s5282_s26 = sphi %s5338_s26, %s6789_s26   ;;  %s5278_s25 = sphi %s5336_s25, %s6788_s25   ;;  %s5274_s24 = sphi %s5334_s24, %s6787_s24  }
   0x6   : > { %s5359_s30 = sadd.s32 1, %s5286_s27   ;;  %s181_s8 = sadd.s32 1, %s5282_s26 }
   0x7   : > { %s178_s9 = ssub.s32 %s5286_s27, %s5359_s30  ;;  %p191_p0 = scmp.ne.s32.totalorder %s5282_s26, %s5278_s25 }
   0x8   : > { %p179_p1 = scmp.eq.s32.totalorder %s178_s9, 0  ;;  %p192_p2 = scmp.eq.s32.totalorder %s5355_s28, 1 }
   0x9   : > { %p197_p3 = scmp.ne.s32.totalorder %s5278_s25, %s5274_s24  ;;  %p198_p4 = scmp.eq.s32.totalorder %s3292_s29, 1 }
   0xa   : > { %s5370_s10 = scalar_select %p179_p1, %s5282_s26, %s181_s8  }
   0xb   : > { %p5372_p5 = por %p192_p2, %p191_p0  ;;  %p5376_p6 = por %p198_p4, %p197_p3 }
   0xc   : > { %p3293_p7 = scmp.ge.s32.totalorder %s5286_s27, 1  ;;  %p205_p8 = scmp.lt.s32.totalorder %s5286_s27, 3 }
   0xd   : > { %p5112_p9 = scmp.eq.s32.totalorder %s5355_s28, 0  ;;  %s222_s16 = sshll.u32 %s6779_s3, 4  ;;  %s223_s16 = int_to_ptr.hbm [resolvable:$true] %s222_s16 }
   0xe   : > { %p5383_p10 = pnand %p3293_p7, %p205_p8  ;;  %s5288_s17 = smov [#allocation2]  }
   0xf   : > { %s224_s18 = sshll.u32 %s5288_s17, 4  ;;  %s239_s21 = sshll.u32 %s6781_s5, 4  ;;  %s225_s18 = int_to_ptr.vmem [resolvable:$true] %s224_s18  ;;  %s240_s21 = int_to_ptr.hbm [resolvable:$true] %s239_s21 }
  0x10   : > { %p5101_p11 = pneg %p5383_p10  ;;  %s5289_s22 = smov 256  }
  0x11   : > { %s5290_s23 = smov 16   ;;  %s5291_s29 = smov [#allocation5]  }
  0x12   : > { %p5102_p12 = pnand %p5112_p9, %p5101_p11  ;;  %s241_s8 = sshll.u32 %s5291_s29, 4  ;;  %s242_s8 = int_to_ptr.vmem [resolvable:$true] %s241_s8 }
  0x13   : > { %s5292_s9 = smov 64   ;;  %s5293_s14 = smov 4  }
  0x14   : > { %5104 = dma.hbm_to_vmem [thread:$0]  (!%p5102_p12), %s223_s16, 16384, %s225_s18, [#allocation3], %s5289_s22, %s5289_s22, %s5290_s23  }
  0x15   : > { %5107 = dma.hbm_to_vmem [thread:$0]  (!%p5102_p12), %s240_s21, 4096, %s242_s8, [#allocation6], %s5292_s9, %s5292_s9, %s5293_s14  }
  0x16   : > { %268 = sbr.rel (%p5383_p10) target bundleno = 705 (0x2c1), region = 48 }
  0x1b   : > { %5261 = dma.done.wait (%p5112_p9), [#allocation3], 16384  }
  0x1c   : > { %5263 = vsyncadd (%p5112_p9), [#allocation3], 4294950912 }
  0x1d   : > { %5265 = dma.done.wait (%p5112_p9), [#allocation6], 4096  }
  0x1e   : > { %5267 = vsyncadd (%p5112_p9), [#allocation6], 4294963200  ;;  %v3416_v0 = vld [vmem:[%s6777_s1 + $0xe0] sm:$0xf]  ;;  %v4764_v1 = vld [vmem:[%s6777_s1 + $0xec] sm:$0xf0] }
  0x1f   : > { %v3544_v2 = vld [vmem:[%s6777_s1 + $0x1e0] sm:$0xf]  ;;  %v3417_v3 = vor.u32 %v4764_v1, %v3416_v0  ;;  %v4796_v4 = vld [vmem:[%s6777_s1 + $0x1ec] sm:$0xf0]  ;;  %p306_p13 = scmp.lt.s32.totalorder %s5355_s28, 1  ;;  %vm1512_vm0 = vcmask 130048  }
  0x20   : > { %v3672_v5 = vld [vmem:[%s6777_s1 + $0x2e0] sm:$0xf]  ;;  %v4828_v6 = vld [vmem:[%s6777_s1 + $0x2ec] sm:$0xf0]  ;;  %v3545_v7 = vor.u32 %v4796_v4, %v3544_v2  ;;  %s303_s8 = sand.u32 1, %s5278_s25   ;;  %s4731_s9 = sshll.u32 %s5355_s28, 3 }
  0x21   : > { %v3673_v8 = vor.u32 %v4828_v6, %v3672_v5  ;;  %v3800_v9 = vld [vmem:[%s6777_s1 + $0x3e0] sm:$0xf]  ;;  %v4860_v10 = vld [vmem:[%s6777_s1 + $0x3ec] sm:$0xf0]  ;;  %1516 = vmatpush.bf16.msra.mxu0 %v3417_v3  ;;  %s5531_s29 = scalar_select %p306_p13, %s5355_s28, 1 }
  0x22   : > { %v3400_v11 = vld [vmem:[%s6777_s1 + $0xc0] sm:$0xf]  ;;  %v3801_v12 = vor.u32 %v4860_v10, %v3800_v9  ;;  %v4760_v13 = vld [vmem:[%s6777_s1 + $0xcc] sm:$0xf0]  ;;  %1529 = vmatpush.bf16.msra.mxu1 %v3545_v7  ;;  %s3300_s14 = sshll.u32 %s303_s8, 3  ;;  %s3206_s17 = scalar_lea.hbm %s6783_s7, %s4731_s9 }
  0x23   : > { %v3528_v14 = vld [vmem:[%s6777_s1 + $0x1c0] sm:$0xf]  ;;  %v4792_v15 = vld [vmem:[%s6777_s1 + $0x1cc] sm:$0xf0]  ;;  %1542 = vmatpush.bf16.msra.mxu2 %v3673_v8  ;;  %v3401_v16 = vor.u32 %v4760_v13, %v3400_v11  ;;  %s5090_s15 = smul.u32 56, %s5531_s29  ;;  %s305_s18 = scalar_lea.vmem [#allocation7], %s3300_s14 }
  0x24   : > { %v3529_v17 = vor.u32 %v4792_v15, %v3528_v14  ;;  %v3656_v18 = vld [vmem:[%s6777_s1 + $0x2c0] sm:$0xf]  ;;  %v4824_v19 = vld [vmem:[%s6777_s1 + $0x2cc] sm:$0xf0]  ;;  %1555 = vmatpush.bf16.msra.mxu3 %v3801_v12  ;;  %s3208_s13 = sshll.u32 %s305_s18, 4  ;;  %s3196_s20 = scalar_lea.sflag [#allocation4], %s303_s8  ;;  %s3209_s13 = int_to_ptr.vmem [resolvable:$true] %s3208_s13 }
  0x25   : > { %v3784_v20 = vld [vmem:[%s6777_s1 + $0x3c0] sm:$0xf]  ;;  %v3657_v21 = vor.u32 %v4824_v19, %v3656_v18  ;;  %v4856_v22 = vld [vmem:[%s6777_s1 + $0x3cc] sm:$0xf0]  ;;  %1517 = vmatpush.bf16.msra.mxu0 %v3401_v16  ;;  %s5603_s19 = scalar_lea.vmem %s6776_s0, %s5090_s15  ;;  %s5236_s23 = scalar_lea.hbm %s6783_s7, 16 }
  0x26   : > { %v3384_v23 = vld [vmem:[%s6777_s1 + $0xa0] sm:$0xf]  ;;  %v4756_v24 = vld [vmem:[%s6777_s1 + $0xac] sm:$0xf0]  ;;  %v3785_v25 = vor.u32 %v4856_v22, %v3784_v20  ;;  %1530 = vmatpush.bf16.msra.mxu1 %v3529_v17 }
  0x27   : > { %v3512_v26 = vld [vmem:[%s6777_s1 + $0x1a0] sm:$0xf]  ;;  %v4788_v27 = vld [vmem:[%s6777_s1 + $0x1ac] sm:$0xf0]  ;;  %v3385_v29 = vor.u32 %v4756_v24, %v3384_v23  ;;  %1543 = vmatpush.bf16.msra.mxu2 %v3657_v21 }
  0x28   : > { %v3640_v28 = vld [vmem:[%s6777_s1 + $0x2a0] sm:$0xf]  ;;  %v4820_v30 = vld [vmem:[%s6777_s1 + $0x2ac] sm:$0xf0]  ;;  %v3513_v33 = vor.u32 %v4788_v27, %v3512_v26  ;;  %1556 = vmatpush.bf16.msra.mxu3 %v3785_v25 }
  0x29   : > { %v3768_v31 = vld [vmem:[%s6777_s1 + $0x3a0] sm:$0xf]  ;;  %v4852_v32 = vld [vmem:[%s6777_s1 + $0x3ac] sm:$0xf0]  ;;  %v3641_v34 = vor.u32 %v4820_v30, %v3640_v28  ;;  %1518 = vmatpush.bf16.msra.mxu0 %v3385_v29 }
  0x2a   : > { %v3368_v35 = vld [vmem:[%s6777_s1 + $0x80] sm:$0xf]  ;;  %v4752_v36 = vld [vmem:[%s6777_s1 + $0x8c] sm:$0xf0]  ;;  %v3769_v38 = vor.u32 %v4852_v32, %v3768_v31  ;;  %1531 = vmatpush.bf16.msra.mxu1 %v3513_v33  ;;  %v4762_v33 = vld [vmem:[%s6777_s1 + $0xe4] sm:$0xf] }
  0x2b   : > { %v3496_v37 = vld [vmem:[%s6777_s1 + $0x180] sm:$0xf]  ;;  %v4784_v39 = vld [vmem:[%s6777_s1 + $0x18c] sm:$0xf0]  ;;  %v3369_v44 = vor.u32 %v4752_v36, %v3368_v35  ;;  %1544 = vmatpush.bf16.msra.mxu2 %v3641_v34  ;;  %v3418_v34 = vld [vmem:[%s6777_s1 + $0xf0] sm:$0xf0] }
  0x2c   : > { %v3624_v40 = vld [vmem:[%s6777_s1 + $0x280] sm:$0xf]  ;;  %v4816_v41 = vld [vmem:[%s6777_s1 + $0x28c] sm:$0xf0]  ;;  %v3497_v45 = vor.u32 %v4784_v39, %v3496_v37  ;;  %1557 = vmatpush.bf16.msra.mxu3 %v3769_v38 }
  0x2d   : > { %v3752_v42 = vld [vmem:[%s6777_s1 + $0x380] sm:$0xf]  ;;  %v4848_v43 = vld [vmem:[%s6777_s1 + $0x38c] sm:$0xf0]  ;;  %v3625_v46 = vor.u32 %v4816_v41, %v3624_v40  ;;  %1519 = vmatpush.bf16.msra.mxu0 %v3369_v44  ;;  %v3546_v44 = vld [vmem:[%s6777_s1 + $0x1f0] sm:$0xf0] }
  0x2e   : > { %v3352_v47 = vld [vmem:[%s6777_s1 + $0x60] sm:$0xf]  ;;  %v4748_v48 = vld [vmem:[%s6777_s1 + $0x6c] sm:$0xf0]  ;;  %v3753_v50 = vor.u32 %v4848_v43, %v3752_v42  ;;  %1532 = vmatpush.bf16.msra.mxu1 %v3497_v45  ;;  %v4794_v43 = vld [vmem:[%s6777_s1 + $0x1e4] sm:$0xf] }
  0x2f   : > { %v3480_v49 = vld [vmem:[%s6777_s1 + $0x160] sm:$0xf]  ;;  %v4780_v51 = vld [vmem:[%s6777_s1 + $0x16c] sm:$0xf0]  ;;  %v3353_v56 = vor.u32 %v4748_v48, %v3352_v47  ;;  %1545 = vmatpush.bf16.msra.mxu2 %v3625_v46  ;;  %v315_v45 = vld [vmem:[%s5603_s19 + $0x18] sm:$0xff]  ;;  %v3421_v47 = vor.u32 %v4762_v33, %v3418_v34 }
  0x30   : > { %v3608_v52 = vld [vmem:[%s6777_s1 + $0x260] sm:$0xf]  ;;  %v4812_v53 = vld [vmem:[%s6777_s1 + $0x26c] sm:$0xf0]  ;;  %v3481_v57 = vor.u32 %v4780_v51, %v3480_v49  ;;  %1558 = vmatpush.bf16.msra.mxu3 %v3753_v50 }
  0x31   : > { %v3736_v54 = vld [vmem:[%s6777_s1 + $0x360] sm:$0xf]  ;;  %v4844_v55 = vld [vmem:[%s6777_s1 + $0x36c] sm:$0xf0]  ;;  %v3609_v58 = vor.u32 %v4812_v53, %v3608_v52  ;;  %1520 = vmatpush.bf16.msra.mxu0 %v3353_v56  ;;  %v4758_v53 = vld [vmem:[%s6777_s1 + $0xc4] sm:$0xf] }
  0x32   : > { %v3336_v59 = vld [vmem:[%s6777_s1 + $0x40] sm:$0xf]  ;;  %v4744_v60 = vld [vmem:[%s6777_s1 + $0x4c] sm:$0xf0]  ;;  %v3737_v62 = vor.u32 %v4844_v55, %v3736_v54  ;;  %1533 = vmatpush.bf16.msra.mxu1 %v3481_v57  ;;  %v3402_v54 = vld [vmem:[%s6777_s1 + $0xd0] sm:$0xf0]  ;;  %v5666_v57 = vpack.c.bf16 %v315_v45, %v315_v45 }
  0x33   : > { %v3464_v61 = vld [vmem:[%s6777_s1 + $0x140] sm:$0xf]  ;;  %v4776_v63 = vld [vmem:[%s6777_s1 + $0x14c] sm:$0xf0]  ;;  %v3337_v4 = vor.u32 %v4744_v60, %v3336_v59  ;;  %1546 = vmatpush.bf16.msra.mxu2 %v3609_v58  ;;  %v313_v58 = vld [vmem:[%s5603_s19 + $0x8] sm:$0xff]  ;;  %v3549_v59 = vor.u32 %v4794_v43, %v3546_v44 }
  0x34   : > { %v3592_v0 = vld [vmem:[%s6777_s1 + $0x240] sm:$0xf]  ;;  %v4808_v1 = vld [vmem:[%s6777_s1 + $0x24c] sm:$0xf0]  ;;  %v3465_v5 = vor.u32 %v4776_v63, %v3464_v61  ;;  %1559 = vmatpush.bf16.msra.mxu3 %v3737_v62  ;;  %v4790_v61 = vld [vmem:[%s6777_s1 + $0x1c4] sm:$0xf] }
  0x35   : > { %v3720_v2 = vld [vmem:[%s6777_s1 + $0x340] sm:$0xf]  ;;  %v4840_v3 = vld [vmem:[%s6777_s1 + $0x34c] sm:$0xf0]  ;;  %v3593_v6 = vor.u32 %v4808_v1, %v3592_v0  ;;  %1521 = vmatpush.bf16.msra.mxu0 %v3337_v4  ;;  %v3530_v62 = vld [vmem:[%s6777_s1 + $0x1d0] sm:$0xf0]  ;;  %v3405_v0 = vor.u32 %v4758_v53, %v3402_v54 }
  0x36   : > { %v3320_v7 = vld [vmem:[%s6777_s1 + $0x20] sm:$0xf]  ;;  %v4740_v8 = vld [vmem:[%s6777_s1 + $0x2c] sm:$0xf0]  ;;  %v3721_v10 = vor.u32 %v4840_v3, %v3720_v2  ;;  %1534 = vmatpush.bf16.msra.mxu1 %v3465_v5  ;;  %v4754_v5 = vld [vmem:[%s6777_s1 + $0xa4] sm:$0xf] }
  0x37   : > { %v3448_v9 = vld [vmem:[%s6777_s1 + $0x120] sm:$0xf]  ;;  %v4772_v11 = vld [vmem:[%s6777_s1 + $0x12c] sm:$0xf0]  ;;  %v3321_v16 = vor.u32 %v4740_v8, %v3320_v7  ;;  %1547 = vmatpush.bf16.msra.mxu2 %v3593_v6  ;;  %v3386_v6 = vld [vmem:[%s6777_s1 + $0xb0] sm:$0xf0]  ;;  %v5695_v7 = vpack.c.bf16 %v313_v58, %v313_v58  ;;  %v3533_v8 = vor.u32 %v4790_v61, %v3530_v62 }
  0x38   : > { %v3576_v12 = vld [vmem:[%s6777_s1 + $0x220] sm:$0xf]  ;;  %v4804_v13 = vld [vmem:[%s6777_s1 + $0x22c] sm:$0xf0]  ;;  %v3449_v20 = vor.u32 %v4772_v11, %v3448_v9  ;;  %1560 = vmatpush.bf16.msra.mxu3 %v3721_v10  ;;  %v4786_v10 = vld [vmem:[%s6777_s1 + $0x1a4] sm:$0xf] }
  0x39   : > { %v3704_v14 = vld [vmem:[%s6777_s1 + $0x320] sm:$0xf]  ;;  %v4836_v15 = vld [vmem:[%s6777_s1 + $0x32c] sm:$0xf0]  ;;  %v3577_v21 = vor.u32 %v4804_v13, %v3576_v12  ;;  %1522 = vmatpush.bf16.msra.mxu0 %v3321_v16  ;;  %v3514_v11 = vld [vmem:[%s6777_s1 + $0x1b0] sm:$0xf0]  ;;  %v3389_v13 = vor.u32 %v4754_v5, %v3386_v6 }
  0x3a   : > { %v3304_v17 = vld [vmem:[%s6777_s1] sm:$0xf]  ;;  %v4736_v18 = vld [vmem:[%s6777_s1 + $0xc] sm:$0xf0]  ;;  %v3705_v25 = vor.u32 %v4836_v15, %v3704_v14  ;;  %1535 = vmatpush.bf16.msra.mxu1 %v3449_v20  ;;  %v3517_v20 = vor.u32 %v4786_v10, %v3514_v11  ;;  %v4742_v43 = vld [vmem:[%s6777_s1 + $0x44] sm:$0xf] }
  0x3b   : > { %v3432_v19 = vld [vmem:[%s6777_s1 + $0x100] sm:$0xf]  ;;  %v4768_v22 = vld [vmem:[%s6777_s1 + $0x10c] sm:$0xf0]  ;;  %v3305_v32 = vor.u32 %v4736_v18, %v3304_v17  ;;  %1548 = vmatpush.bf16.msra.mxu2 %v3577_v21  ;;  %v4750_v18 = vld [vmem:[%s6777_s1 + $0x84] sm:$0xf] }
  0x3c   : > { %v3560_v23 = vld [vmem:[%s6777_s1 + $0x200] sm:$0xf]  ;;  %v4800_v24 = vld [vmem:[%s6777_s1 + $0x20c] sm:$0xf0]  ;;  %v3433_v36 = vor.u32 %v4768_v22, %v3432_v19  ;;  %1561 = vmatpush.bf16.msra.mxu3 %v3705_v25  ;;  %v3370_v19 = vld [vmem:[%s6777_s1 + $0x90] sm:$0xf0] }
  0x3d   : > { %v3688_v26 = vld [vmem:[%s6777_s1 + $0x300] sm:$0xf]  ;;  %v4832_v27 = vld [vmem:[%s6777_s1 + $0x30c] sm:$0xf0]  ;;  %v3561_v37 = vor.u32 %v4800_v24, %v3560_v23  ;;  %1523 = vmatpush.bf16.msra.mxu0 %v3305_v32  ;;  %v4782_v22 = vld [vmem:[%s6777_s1 + $0x184] sm:$0xf]  ;;  %v3373_v25 = vor.u32 %v4750_v18, %v3370_v19 }
  0x3e   : > { %v3928_v28 = vld [vmem:[%s6777_s1 + $0x4e0] sm:$0xf]  ;;  %v4892_v29 = vld [vmem:[%s6777_s1 + $0x4ec] sm:$0xf0]  ;;  %v3689_v41 = vor.u32 %v4832_v27, %v3688_v26  ;;  %1536 = vmatpush.bf16.msra.mxu1 %v3433_v36  ;;  %v3498_v23 = vld [vmem:[%s6777_s1 + $0x190] sm:$0xf0] }
  0x3f   : > { %v4056_v30 = vld [vmem:[%s6777_s1 + $0x5e0] sm:$0xf]  ;;  %v4924_v31 = vld [vmem:[%s6777_s1 + $0x5ec] sm:$0xf0]  ;;  %v3929_v42 = vor.u32 %v4892_v29, %v3928_v28  ;;  %1549 = vmatpush.bf16.msra.mxu2 %v3561_v37  ;;  %v3501_v33 = vor.u32 %v4782_v22, %v3498_v23  ;;  %v3482_v36 = vld [vmem:[%s6777_s1 + $0x170] sm:$0xf0] }
  0x40   : > { %v314_v35 = vld [vmem:[%s5603_s19 + $0x10] sm:$0xff]  ;;  %v4072_v38 = vld [vmem:[%s6777_s1 + $0x600] sm:$0xf]  ;;  %v4057_v46 = vor.u32 %v4924_v31, %v4056_v30  ;;  %1562 = vmatpush.bf16.msra.mxu3 %v3689_v41  ;;  %v4746_v30 = vld [vmem:[%s6777_s1 + $0x64] sm:$0xf] }
  0x41   : > { %v4928_v39 = vld [vmem:[%s6777_s1 + $0x60c] sm:$0xf0]  ;;  %v312_v40 = vld [vmem:[%s5603_s19] sm:$0xff]  ;;  %v5653_v51 = vpack.c.bf16 %v314_v35, %v314_v35  ;;  %1568 = vmatpush.bf16.msrb.mxu0 %v3929_v42  ;;  %1537 = vmatmul.bf16.vlgmr.msra.gmra.mxu1 %v5695_v7  ;;  %v3354_v31 = vld [vmem:[%s6777_s1 + $0x70] sm:$0xf0] }
  0x42   : > { %v3912_v48 = vld [vmem:[%s6777_s1 + $0x4c0] sm:$0xf]  ;;  %v4888_v49 = vld [vmem:[%s6777_s1 + $0x4cc] sm:$0xf0]  ;;  %v5664_v55 = vpack.c.bf16 %v312_v40, %v312_v40  ;;  %v4073_v56 = vor.u32 %v4928_v39, %v4072_v38  ;;  %1581 = vmatpush.bf16.msrb.mxu1 %v4057_v46  ;;  %v4778_v35 = vld [vmem:[%s6777_s1 + $0x164] sm:$0xf]  ;;  %v3357_v38 = vor.u32 %v4746_v30, %v3354_v31 }
  0x43   : > { %v4040_v50 = vld [vmem:[%s6777_s1 + $0x5c0] sm:$0xf]  ;;  %v4920_v52 = vld [vmem:[%s6777_s1 + $0x5cc] sm:$0xf0]  ;;  %v3913_v60 = vor.u32 %v4888_v49, %v3912_v48  ;;  %1550 = vmatmul.bf16.vlgmr.msra.gmra.mxu2 %v5653_v51  ;;  %1563 = vmatmul.bf16.vlgmr.msra.gmra.mxu3 %v5666_v57  ;;  %v3338_v44 = vld [vmem:[%s6777_s1 + $0x50] sm:$0xf0]  ;;  %v3485_v46 = vor.u32 %v4778_v35, %v3482_v36 }
  0x44   : > { %1607 = vmatpush.bf16.msrb.mxu3 %v3421_v47  ;;  %v4041_v63 = vor.u32 %v4920_v52, %v4040_v50  ;;  %v3896_v1 = vld [vmem:[%s6777_s1 + $0x4a0] sm:$0xf]  ;;  %v4884_v2 = vld [vmem:[%s6777_s1 + $0x4ac] sm:$0xf0]  ;;  %1524 = vmatmul.bf16.vlgmr.msra.gmra.mxu0 %v5664_v55  ;;  %v4774_v48 = vld [vmem:[%s6777_s1 + $0x144] sm:$0xf]  ;;  %v3341_v52 = vor.u32 %v4742_v43, %v3338_v44 }
  0x45   : > { %v4024_v3 = vld [vmem:[%s6777_s1 + $0x5a0] sm:$0xf]  ;;  %v4916_v4 = vld [vmem:[%s6777_s1 + $0x5ac] sm:$0xf0]  ;;  %1601 = vmatpush.bf16.msrb.mxu2 %v4073_v56  ;;  %1569 = vmatpush.bf16.msrb.mxu0 %v3913_v60  ;;  %v3897_v9 = vor.u32 %v4884_v2, %v3896_v1  ;;  %v3466_v49 = vld [vmem:[%s6777_s1 + $0x150] sm:$0xf0] }
  0x46   : > { %1582 = vmatpush.bf16.msrb.mxu1 %v4041_v63  ;;  %v4025_v12 = vor.u32 %v4916_v4, %v4024_v3  ;;  %v3880_v14 = vld [vmem:[%s6777_s1 + $0x480] sm:$0xf]  ;;  %v4880_v15 = vld [vmem:[%s6777_s1 + $0x48c] sm:$0xf0]  ;;  %v3322_v60 = vld [vmem:[%s6777_s1 + $0x30] sm:$0xf0]  ;;  %v3469_v61 = vor.u32 %v4774_v48, %v3466_v49 }
  0x47   : > { %v4008_v16 = vld [vmem:[%s6777_s1 + $0x580] sm:$0xf]  ;;  %v4912_v17 = vld [vmem:[%s6777_s1 + $0x58c] sm:$0xf0]  ;;  %v3881_v21 = vor.u32 %v4880_v15, %v3880_v14  ;;  %v4770_v63 = vld [vmem:[%s6777_s1 + $0x124] sm:$0xf] }
  0x48   : > { %1608 = vmatpush.bf16.msrb.mxu3 %v3405_v0  ;;  %v4009_v24 = vor.u32 %v4912_v17, %v4008_v16  ;;  %v3864_v26 = vld [vmem:[%s6777_s1 + $0x460] sm:$0xf]  ;;  %v4876_v27 = vld [vmem:[%s6777_s1 + $0x46c] sm:$0xf0]  ;;  %v3450_v0 = vld [vmem:[%s6777_s1 + $0x130] sm:$0xf0] }
  0x49   : > { %1620 = vmatpush.bf16.msra.mxu2 %v3549_v59  ;;  %1570 = vmatpush.bf16.msrb.mxu0 %v3897_v9  ;;  %v3992_v28 = vld [vmem:[%s6777_s1 + $0x560] sm:$0xf]  ;;  %v4908_v29 = vld [vmem:[%s6777_s1 + $0x56c] sm:$0xf0]  ;;  %v3865_v34 = vor.u32 %v4876_v27, %v3864_v26  ;;  %v4738_v59 = vld [vmem:[%s6777_s1 + $0x24] sm:$0xf]  ;;  %v3453_v14 = vor.u32 %v4770_v63, %v3450_v0 }
  0x4a   : > { %1583 = vmatpush.bf16.msrb.mxu1 %v4025_v12  ;;  %v318_v32 = vld [vmem:[%s5603_s19 + $0x30] sm:$0xff]  ;;  %v3993_v37 = vor.u32 %v4908_v29, %v3992_v28  ;;  %v3848_v39 = vld [vmem:[%s6777_s1 + $0x440] sm:$0xf]  ;;  %v3325_v3 = vor.u32 %v4738_v59, %v3322_v60  ;;  %v4826_v10 = vld [vmem:[%s6777_s1 + $0x2e4] sm:$0xf] }
  0x4b   : > { %v4872_v40 = vld [vmem:[%s6777_s1 + $0x44c] sm:$0xf0]  ;;  %v3976_v41 = vld [vmem:[%s6777_s1 + $0x540] sm:$0xf]  ;;  %v5772_v45 = vpack.c.bf16 %v318_v32, %v318_v32  ;;  %v3306_v9 = vld [vmem:[%s6777_s1 + $0x10] sm:$0xf0] }
  0x4c   : > { %1609 = vmatpush.bf16.msrb.mxu3 %v3389_v13  ;;  %v4904_v42 = vld [vmem:[%s6777_s1 + $0x54c] sm:$0xf0]  ;;  %v3849_v47 = vor.u32 %v4872_v40, %v3848_v39  ;;  %v3832_v53 = vld [vmem:[%s6777_s1 + $0x420] sm:$0xf]  ;;  %v3674_v11 = vld [vmem:[%s6777_s1 + $0x2f0] sm:$0xf0] }
  0x4d   : > { %1621 = vmatpush.bf16.msra.mxu2 %v3533_v8  ;;  %1571 = vmatpush.bf16.msrb.mxu0 %v3881_v21  ;;  %v3977_v50 = vor.u32 %v4904_v42, %v3976_v41  ;;  %v4868_v54 = vld [vmem:[%s6777_s1 + $0x42c] sm:$0xf0]  ;;  %v3960_v56 = vld [vmem:[%s6777_s1 + $0x520] sm:$0xf]  ;;  %v4734_v8 = vld [vmem:[%s6777_s1 + $0x4] sm:$0xf] }
  0x4e   : > { %1584 = vmatpush.bf16.msrb.mxu1 %v4009_v24  ;;  %v4900_v58 = vld [vmem:[%s6777_s1 + $0x52c] sm:$0xf0]  ;;  %v3833_v62 = vor.u32 %v4868_v54, %v3832_v53  ;;  %v3816_v1 = vld [vmem:[%s6777_s1 + $0x400] sm:$0xf]  ;;  %v4858_v12 = vld [vmem:[%s6777_s1 + $0x3e4] sm:$0xf]  ;;  %v3677_v24 = vor.u32 %v4826_v10, %v3674_v11 }
  0x4f   : > { %v3961_v2 = vor.u32 %v4900_v58, %v3960_v56  ;;  %v4864_v4 = vld [vmem:[%s6777_s1 + $0x40c] sm:$0xf0]  ;;  %v3944_v5 = vld [vmem:[%s6777_s1 + $0x500] sm:$0xf]  ;;  %v3802_v13 = vld [vmem:[%s6777_s1 + $0x3f0] sm:$0xf0] }
  0x50   : > { %1610 = vmatpush.bf16.msrb.mxu3 %v3373_v25  ;;  %v4896_v6 = vld [vmem:[%s6777_s1 + $0x50c] sm:$0xf0]  ;;  %v3817_v15 = vor.u32 %v4864_v4, %v3816_v1  ;;  %v4890_v16 = vld [vmem:[%s6777_s1 + $0x4e4] sm:$0xf]  ;;  %v3930_v17 = vld [vmem:[%s6777_s1 + $0x4f0] sm:$0xf0]  ;;  %v3805_v25 = vor.u32 %v4858_v12, %v3802_v13 }
  0x51   : > { %1622 = vmatpush.bf16.msra.mxu2 %v3517_v20  ;;  %1572 = vmatpush.bf16.msrb.mxu0 %v3865_v34  ;;  %v316_v18 = vld [vmem:[%s5603_s19 + $0x20] sm:$0xff]  ;;  %v3945_v19 = vor.u32 %v4896_v6, %v3944_v5  ;;  %v3309_v20 = vor.u32 %v4734_v8, %v3306_v9  ;;  %v3434_v22 = vld [vmem:[%s6777_s1 + $0x110] sm:$0xf0]  ;;  %v317_v23 = vld [vmem:[%s5603_s19 + $0x28] sm:$0xff]  ;;  %v3933_v29 = vor.u32 %v4890_v16, %v3930_v17  ;;  %s3210_s19 = sshll.u32 %s3206_s17, 4  ;;  %s3211_s19 = int_to_ptr.hbm [resolvable:$true] %s3210_s19 }
  0x52   : > { %1585 = vmatpush.bf16.msrb.mxu1 %v3993_v37  ;;  %v4766_v21 = vld [vmem:[%s6777_s1 + $0x104] sm:$0xf]  ;;  %v4058_v27 = vld [vmem:[%s6777_s1 + $0x5f0] sm:$0xf0]  ;;  %v5859_v30 = vpack.c.bf16 %v316_v18, %v316_v18  ;;  %v5870_v35 = vpack.c.bf16 %v317_v23, %v317_v23  ;;  %s5230_s21 = sshra.s32 %s3211_s19, 4  ;;  %s5231_s21 = int_to_ptr.hbm [resolvable:$true] %s5230_s21 }
  0x53   : > { %4086 = vmatmul.msk.bf16.vlgmr.msrb.gmra.mxu2 %vm1512_vm0, %v5772_v45  ;;  %v4922_v26 = vld [vmem:[%s6777_s1 + $0x5e4] sm:$0xf]  ;;  %v3658_v31 = vld [vmem:[%s6777_s1 + $0x2d0] sm:$0xf0]  ;;  %v3437_v34 = vor.u32 %v4766_v21, %v3434_v22  ;;  %s5232_s28 = scalar_lea.hbm %s5231_s21, 8  ;;  %p5237_p3 = scmp.lt.s32.totalorder %s5231_s21, %s6783_s7 }
  0x54   : > { %1611 = vmatpush.bf16.msrb.mxu3 %v3357_v38  ;;  %v4822_v28 = vld [vmem:[%s6777_s1 + $0x2c4] sm:$0xf]  ;;  %v3914_v37 = vld [vmem:[%s6777_s1 + $0x4d0] sm:$0xf0]  ;;  %v4061_v38 = vor.u32 %v4922_v26, %v4058_v27  ;;  %p5233_p0 = scmp.ne.s32.totalorder %s5231_s21, %s5232_s28  ;;  %p5238_p4 = scmp.lt.s32.totalorder %s5236_s23, %s5232_s28 }
  0x55   : > { %1623 = vmatpush.bf16.msra.mxu2 %v3501_v33  ;;  %1573 = vmatpush.bf16.msrb.mxu0 %v3849_v47  ;;  %v4854_v32 = vld [vmem:[%s6777_s1 + $0x3c4] sm:$0xf]  ;;  %v3786_v33 = vld [vmem:[%s6777_s1 + $0x3d0] sm:$0xf0]  ;;  %v3661_v39 = vor.u32 %v4822_v28, %v3658_v31 }
  0x56   : > { %1586 = vmatpush.bf16.msrb.mxu1 %v3977_v50  ;;  %v4886_v36 = vld [vmem:[%s6777_s1 + $0x4c4] sm:$0xf]  ;;  %v3789_v40 = vor.u32 %v4854_v32, %v3786_v33  ;;  %v4042_v42 = vld [vmem:[%s6777_s1 + $0x5d0] sm:$0xf0]  ;;  %p5234_p1 = pnand %p5233_p0, %p5372_p5  ;;  %p5239_p7 = por %p5238_p4, %p5237_p3 }
  0x57   : > { %v4918_v41 = vld [vmem:[%s6777_s1 + $0x5c4] sm:$0xf]  ;;  %v3917_v44 = vor.u32 %v4886_v36, %v3914_v37  ;;  %v3770_v48 = vld [vmem:[%s6777_s1 + $0x3b0] sm:$0xf0] }
  0x58   : > { %1612 = vmatpush.bf16.msrb.mxu3 %v3341_v52  ;;  %v4818_v43 = vld [vmem:[%s6777_s1 + $0x2a4] sm:$0xf]  ;;  %v3898_v50 = vld [vmem:[%s6777_s1 + $0x4b0] sm:$0xf0]  ;;  %v4045_v52 = vor.u32 %v4918_v41, %v4042_v42  ;;  %p5235_p2 = pneg %p5234_p1 }
  0x59   : > { %1624 = vmatpush.bf16.msra.mxu2 %v3485_v46  ;;  %1574 = vmatpush.bf16.msrb.mxu0 %v3833_v62  ;;  %v3642_v46 = vld [vmem:[%s6777_s1 + $0x2b0] sm:$0xf0]  ;;  %v4850_v47 = vld [vmem:[%s6777_s1 + $0x3a4] sm:$0xf] }
  0x5a   : > { %1587 = vmatpush.bf16.msrb.mxu1 %v3961_v2  ;;  %v4882_v49 = vld [vmem:[%s6777_s1 + $0x4a4] sm:$0xf]  ;;  %v3645_v53 = vor.u32 %v4818_v43, %v3642_v46  ;;  %v3773_v54 = vor.u32 %v4850_v47, %v3770_v48  ;;  %v4026_v58 = vld [vmem:[%s6777_s1 + $0x5b0] sm:$0xf0]  ;;  %p5240_p8 = pnand %p5239_p7, %p5235_p2 }
  0x5b   : > { %v4914_v56 = vld [vmem:[%s6777_s1 + $0x5a4] sm:$0xf]  ;;  %v3901_v60 = vor.u32 %v4882_v49, %v3898_v50  ;;  %v3754_v63 = vld [vmem:[%s6777_s1 + $0x390] sm:$0xf0] }
  0x5c   : > { %1613 = vmatpush.bf16.msrb.mxu3 %v3325_v3  ;;  %v4814_v59 = vld [vmem:[%s6777_s1 + $0x284] sm:$0xf]  ;;  %v3882_v1 = vld [vmem:[%s6777_s1 + $0x490] sm:$0xf0]  ;;  %v4029_v2 = vor.u32 %v4914_v56, %v4026_v58  ;;  %v3424_v56 = vld [vmem:[%s6777_s1 + $0xe8] sm:$0xf] }
  0x5d   : > { %1625 = vmatpush.bf16.msra.mxu2 %v3469_v61  ;;  %1575 = vmatpush.bf16.msrb.mxu0 %v3817_v15  ;;  %v3626_v61 = vld [vmem:[%s6777_s1 + $0x290] sm:$0xf0]  ;;  %v4846_v62 = vld [vmem:[%s6777_s1 + $0x384] sm:$0xf]  ;;  %v4765_v58 = vld [vmem:[%s6777_s1 + $0xf4] sm:$0xf0] }
  0x5e   : > { %1588 = vmatpush.bf16.msrb.mxu1 %v3945_v19  ;;  %v4878_v0 = vld [vmem:[%s6777_s1 + $0x484] sm:$0xf]  ;;  %v3629_v3 = vor.u32 %v4814_v59, %v3626_v61  ;;  %v3757_v4 = vor.u32 %v4846_v62, %v3754_v63  ;;  %v4010_v6 = vld [vmem:[%s6777_s1 + $0x590] sm:$0xf0]  ;;  %v3680_v62 = vld [vmem:[%s6777_s1 + $0x2e8] sm:$0xf] }
  0x5f   : > { %v4910_v5 = vld [vmem:[%s6777_s1 + $0x584] sm:$0xf]  ;;  %v3885_v9 = vor.u32 %v4878_v0, %v3882_v1  ;;  %v3610_v10 = vld [vmem:[%s6777_s1 + $0x270] sm:$0xf0]  ;;  %v4829_v63 = vld [vmem:[%s6777_s1 + $0x2f4] sm:$0xf0] }
  0x60   : > { %1614 = vmatpush.bf16.msrb.mxu3 %v3309_v20  ;;  %1576 = vmatmul.bf16.vlgmr.msrb.gmra.mxu0 %v5859_v30  ;;  %v4810_v8 = vld [vmem:[%s6777_s1 + $0x264] sm:$0xf]  ;;  %v3738_v12 = vld [vmem:[%s6777_s1 + $0x370] sm:$0xf0]  ;;  %v4013_v15 = vor.u32 %v4910_v5, %v4010_v6  ;;  %v3425_v5 = vor.u32 %v4765_v58, %v3424_v56  ;;  %v3808_v6 = vld [vmem:[%s6777_s1 + $0x3e8] sm:$0xf] }
  0x61   : > { %1626 = vmatpush.bf16.msra.mxu2 %v3453_v14  ;;  %1633 = vmatpush.bf16.msra.mxu0 %v3677_v24  ;;  %v4842_v11 = vld [vmem:[%s6777_s1 + $0x364] sm:$0xf]  ;;  %v3866_v14 = vld [vmem:[%s6777_s1 + $0x470] sm:$0xf0]  ;;  %v3613_v16 = vor.u32 %v4810_v8, %v3610_v10  ;;  %v4861_v8 = vld [vmem:[%s6777_s1 + $0x3f4] sm:$0xf0] }
  0x62   : > { %1646 = vmatpush.bf16.msra.mxu1 %v3805_v25  ;;  %v4874_v13 = vld [vmem:[%s6777_s1 + $0x464] sm:$0xf]  ;;  %v3741_v17 = vor.u32 %v4842_v11, %v3738_v12  ;;  %v3994_v19 = vld [vmem:[%s6777_s1 + $0x570] sm:$0xf0]  ;;  %v3552_v10 = vld [vmem:[%s6777_s1 + $0x1e8] sm:$0xf]  ;;  %v3681_v12 = vor.u32 %v4829_v63, %v3680_v62 }
  0x63   : > { %1589 = vmatmul.bf16.vlgmr.msrb.gmra.mxu1 %v5870_v35  ;;  %1615 = vmatmul.bf16.vlgmr.msrb.gmra.mxu3 %v5664_v55  ;;  %v4906_v18 = vld [vmem:[%s6777_s1 + $0x564] sm:$0xf]  ;;  %v3869_v21 = vor.u32 %v4874_v13, %v3866_v14  ;;  %v3594_v22 = vld [vmem:[%s6777_s1 + $0x250] sm:$0xf0]  ;;  %v4797_v11 = vld [vmem:[%s6777_s1 + $0x1f4] sm:$0xf0] }
  0x64   : > { %1659 = vmatpush.bf16.msra.mxu3 %v3933_v29  ;;  %v4806_v20 = vld [vmem:[%s6777_s1 + $0x244] sm:$0xf]  ;;  %v3722_v24 = vld [vmem:[%s6777_s1 + $0x350] sm:$0xf0]  ;;  %v3997_v27 = vor.u32 %v4906_v18, %v3994_v19  ;;  %v3408_v14 = vld [vmem:[%s6777_s1 + $0xc8] sm:$0xf]  ;;  %v3553_v19 = vor.u32 %v4797_v11, %v3552_v10 }
  0x65   : > { %1627 = vmatpush.bf16.msra.mxu2 %v3437_v34  ;;  %1634 = vmatpush.bf16.msra.mxu0 %v3661_v39  ;;  %v4838_v23 = vld [vmem:[%s6777_s1 + $0x344] sm:$0xf]  ;;  %v3850_v26 = vld [vmem:[%s6777_s1 + $0x450] sm:$0xf0]  ;;  %v3597_v28 = vor.u32 %v4806_v20, %v3594_v22  ;;  %v4825_v18 = vld [vmem:[%s6777_s1 + $0x2d4] sm:$0xf0] }
  0x66   : > { %1647 = vmatpush.bf16.msra.mxu1 %v3789_v40  ;;  %v4870_v25 = vld [vmem:[%s6777_s1 + $0x444] sm:$0xf]  ;;  %v3725_v29 = vor.u32 %v4838_v23, %v3722_v24  ;;  %v3978_v32 = vld [vmem:[%s6777_s1 + $0x550] sm:$0xf0]  ;;  %v3792_v20 = vld [vmem:[%s6777_s1 + $0x3c8] sm:$0xf] }
  0x67   : > { %v4902_v31 = vld [vmem:[%s6777_s1 + $0x544] sm:$0xf]  ;;  %v3853_v34 = vor.u32 %v4870_v25, %v3850_v26  ;;  %v3578_v36 = vld [vmem:[%s6777_s1 + $0x230] sm:$0xf0]  ;;  %v3536_v23 = vld [vmem:[%s6777_s1 + $0x1c8] sm:$0xf] }
  0x68   : > { %1660 = vmatpush.bf16.msra.mxu3 %v3917_v44  ;;  %1628 = vmatmul.bf16.vlgmr.msra.gmra.mxu2 %v5695_v7  ;;  %v4802_v33 = vld [vmem:[%s6777_s1 + $0x224] sm:$0xf]  ;;  %v3834_v40 = vld [vmem:[%s6777_s1 + $0x430] sm:$0xf0]  ;;  %v3981_v41 = vor.u32 %v4902_v31, %v3978_v32  ;;  %v4793_v24 = vld [vmem:[%s6777_s1 + $0x1d4] sm:$0xf0] }
  0x69   : > { %1672 = vmatpush.bf16.msrb.mxu2 %v4061_v38  ;;  %1635 = vmatpush.bf16.msra.mxu0 %v3645_v53  ;;  %v4834_v37 = vld [vmem:[%s6777_s1 + $0x324] sm:$0xf]  ;;  %v3706_v38 = vld [vmem:[%s6777_s1 + $0x330] sm:$0xf0]  ;;  %v3581_v46 = vor.u32 %v4802_v33, %v3578_v36  ;;  %v3392_v26 = vld [vmem:[%s6777_s1 + $0xa8] sm:$0xf]  ;;  %v3537_v32 = vor.u32 %v4793_v24, %v3536_v23 }
  0x6a   : > { %1648 = vmatpush.bf16.msra.mxu1 %v3773_v54  ;;  %v4866_v39 = vld [vmem:[%s6777_s1 + $0x424] sm:$0xf]  ;;  %v3962_v43 = vld [vmem:[%s6777_s1 + $0x530] sm:$0xf0]  ;;  %v3709_v47 = vor.u32 %v4834_v37, %v3706_v38  ;;  %v4821_v31 = vld [vmem:[%s6777_s1 + $0x2b4] sm:$0xf0] }
  0x6b   : > { %v4898_v42 = vld [vmem:[%s6777_s1 + $0x524] sm:$0xf]  ;;  %v3562_v48 = vld [vmem:[%s6777_s1 + $0x210] sm:$0xf0]  ;;  %v3776_v33 = vld [vmem:[%s6777_s1 + $0x3a8] sm:$0xf] }
  0x6c   : > { %1661 = vmatpush.bf16.msra.mxu3 %v3901_v60  ;;  %v4798_v44 = vld [vmem:[%s6777_s1 + $0x204] sm:$0xf]  ;;  %v3690_v50 = vld [vmem:[%s6777_s1 + $0x310] sm:$0xf0]  ;;  %v3965_v60 = vor.u32 %v4898_v42, %v3962_v43  ;;  %v3520_v37 = vld [vmem:[%s6777_s1 + $0x1a8] sm:$0xf] }
  0x6d   : > { %1673 = vmatpush.bf16.msrb.mxu2 %v4045_v52  ;;  %1636 = vmatpush.bf16.msra.mxu0 %v3629_v3  ;;  %v4830_v49 = vld [vmem:[%s6777_s1 + $0x304] sm:$0xf]  ;;  %v3837_v52 = vor.u32 %v4866_v39, %v3834_v40  ;;  %v3818_v54 = vld [vmem:[%s6777_s1 + $0x410] sm:$0xf0]  ;;  %v3565_v0 = vor.u32 %v4798_v44, %v3562_v48  ;;  %v4789_v38 = vld [vmem:[%s6777_s1 + $0x1b4] sm:$0xf0] }
  0x6e   : > { %1649 = vmatpush.bf16.msra.mxu1 %v3757_v4  ;;  %v4862_v53 = vld [vmem:[%s6777_s1 + $0x404] sm:$0xf]  ;;  %v4074_v61 = vld [vmem:[%s6777_s1 + $0x610] sm:$0xf0]  ;;  %v3693_v1 = vor.u32 %v4830_v49, %v3690_v50  ;;  %v3376_v40 = vld [vmem:[%s6777_s1 + $0x88] sm:$0xf] }
  0x6f   : > { %v4926_v59 = vld [vmem:[%s6777_s1 + $0x604] sm:$0xf]  ;;  %v3946_v3 = vld [vmem:[%s6777_s1 + $0x510] sm:$0xf0]  ;;  %v3821_v4 = vor.u32 %v4862_v53, %v3818_v54  ;;  %v3632_v43 = vld [vmem:[%s6777_s1 + $0x288] sm:$0xf] }
  0x70   : > { %1662 = vmatpush.bf16.msra.mxu3 %v3885_v9  ;;  %v4077_v9 = vor.u32 %v4926_v59, %v4074_v61  ;;  %v4817_v44 = vld [vmem:[%s6777_s1 + $0x294] sm:$0xf0]  ;;  %v3504_v50 = vld [vmem:[%s6777_s1 + $0x188] sm:$0xf] }
  0x71   : > { %1674 = vmatpush.bf16.msrb.mxu2 %v4029_v2  ;;  %1637 = vmatpush.bf16.msra.mxu0 %v3613_v16  ;;  %v4894_v2 = vld [vmem:[%s6777_s1 + $0x504] sm:$0xf]  ;;  %v3809_v16 = vor.u32 %v4861_v8, %v3808_v6  ;;  %v4849_v48 = vld [vmem:[%s6777_s1 + $0x394] sm:$0xf0]  ;;  %v3633_v53 = vor.u32 %v4817_v44, %v3632_v43  ;;  %v3360_v54 = vld [vmem:[%s6777_s1 + $0x68] sm:$0xf] }
  0x72   : > { %1650 = vmatpush.bf16.msra.mxu1 %v3741_v17  ;;  %v3949_v13 = vor.u32 %v4894_v2, %v3946_v3  ;;  %v3664_v17 = vld [vmem:[%s6777_s1 + $0x2c8] sm:$0xf]  ;;  %v4749_v56 = vld [vmem:[%s6777_s1 + $0x74] sm:$0xf0] }
  0x73   : > { %v3665_v25 = vor.u32 %v4825_v18, %v3664_v17  ;;  %v3616_v59 = vld [vmem:[%s6777_s1 + $0x268] sm:$0xf]  ;;  %v4845_v63 = vld [vmem:[%s6777_s1 + $0x374] sm:$0xf0] }
  0x74   : > { %1663 = vmatpush.bf16.msra.mxu3 %v3869_v21  ;;  %v4857_v21 = vld [vmem:[%s6777_s1 + $0x3d4] sm:$0xf0]  ;;  %v3744_v62 = vld [vmem:[%s6777_s1 + $0x368] sm:$0xf] }
  0x75   : > { %1675 = vmatpush.bf16.msrb.mxu2 %v4013_v15  ;;  %1638 = vmatpush.bf16.msra.mxu0 %v3597_v28  ;;  %v4761_v15 = vld [vmem:[%s6777_s1 + $0xd4] sm:$0xf0]  ;;  %v3793_v28 = vor.u32 %v4857_v21, %v3792_v20  ;;  %v3745_v6 = vor.u32 %v4845_v63, %v3744_v62  ;;  %v3600_v8 = vld [vmem:[%s6777_s1 + $0x248] sm:$0xf] }
  0x76   : > { %1651 = vmatpush.bf16.msra.mxu1 %v3725_v29  ;;  %v3409_v22 = vor.u32 %v4761_v15, %v3408_v14  ;;  %v3648_v29 = vld [vmem:[%s6777_s1 + $0x2a8] sm:$0xf]  ;;  %v4781_v2 = vld [vmem:[%s6777_s1 + $0x174] sm:$0xf0] }
  0x77   : > { %v3649_v39 = vor.u32 %v4821_v31, %v3648_v29  ;;  %v3728_v11 = vld [vmem:[%s6777_s1 + $0x348] sm:$0xf]  ;;  %v4777_v15 = vld [vmem:[%s6777_s1 + $0x154] sm:$0xf0] }
  0x78   : > { %1664 = vmatpush.bf16.msra.mxu3 %v3853_v34  ;;  %v4853_v34 = vld [vmem:[%s6777_s1 + $0x3b4] sm:$0xf0]  ;;  %v3472_v14 = vld [vmem:[%s6777_s1 + $0x148] sm:$0xf] }
  0x79   : > { %1676 = vmatpush.bf16.msrb.mxu2 %v3997_v27  ;;  %1639 = vmatpush.bf16.msra.mxu0 %v3581_v46  ;;  %v4757_v27 = vld [vmem:[%s6777_s1 + $0xb4] sm:$0xf0]  ;;  %v3777_v42 = vor.u32 %v4853_v34, %v3776_v33  ;;  %v3521_v46 = vor.u32 %v4789_v38, %v3520_v37  ;;  %v3328_v17 = vld [vmem:[%s6777_s1 + $0x28] sm:$0xf] }
  0x7a   : > { %1652 = vmatpush.bf16.msra.mxu1 %v3709_v47  ;;  %v3393_v36 = vor.u32 %v4757_v27, %v3392_v26  ;;  %v3760_v47 = vld [vmem:[%s6777_s1 + $0x388] sm:$0xf]  ;;  %v4741_v18 = vld [vmem:[%s6777_s1 + $0x34] sm:$0xf0] }
  0x7b   : > { %v3761_v58 = vor.u32 %v4849_v48, %v3760_v47  ;;  %v3584_v20 = vld [vmem:[%s6777_s1 + $0x228] sm:$0xf]  ;;  %v4805_v21 = vld [vmem:[%s6777_s1 + $0x234] sm:$0xf0]  ;;  %v4763_v47 = vld [vmem:[%s6777_s1 + $0xec] sm:$0xf] }
  0x7c   : > { %1665 = vmatpush.bf16.msra.mxu3 %v3837_v52  ;;  %v4785_v52 = vld [vmem:[%s6777_s1 + $0x194] sm:$0xf0]  ;;  %v3712_v23 = vld [vmem:[%s6777_s1 + $0x328] sm:$0xf]  ;;  %v3585_v29 = vor.u32 %v4805_v21, %v3584_v20  ;;  %v3426_v48 = vld [vmem:[%s6777_s1 + $0xf8] sm:$0xf0] }
  0x7d   : > { %1677 = vmatpush.bf16.msrb.mxu2 %v3981_v41  ;;  %1640 = vmatpush.bf16.msra.mxu0 %v3565_v0  ;;  %v4753_v41 = vld [vmem:[%s6777_s1 + $0x94] sm:$0xf0]  ;;  %v3505_v61 = vor.u32 %v4785_v52, %v3504_v50  ;;  %v3361_v0 = vor.u32 %v4749_v56, %v3360_v54  ;;  %v3456_v26 = vld [vmem:[%s6777_s1 + $0x128] sm:$0xf]  ;;  %v3429_v63 = vor.u32 %v4763_v47, %v3426_v48 }
  0x7e   : > { %1653 = vmatpush.bf16.msra.mxu1 %v3693_v1  ;;  %v3377_v49 = vor.u32 %v4753_v41, %v3376_v40  ;;  %v3488_v1 = vld [vmem:[%s6777_s1 + $0x168] sm:$0xf]  ;;  %v4837_v24 = vld [vmem:[%s6777_s1 + $0x334] sm:$0xf0] }
  0x7f   : > { %v3489_v10 = vor.u32 %v4781_v2, %v3488_v1  ;;  %v4773_v27 = vld [vmem:[%s6777_s1 + $0x134] sm:$0xf0]  ;;  %v3713_v34 = vor.u32 %v4837_v24, %v3712_v23  ;;  %v3568_v37 = vld [vmem:[%s6777_s1 + $0x208] sm:$0xf]  ;;  %v4759_v1 = vld [vmem:[%s6777_s1 + $0xcc] sm:$0xf] }
  0x80   : > { %1666 = vmatpush.bf16.msra.mxu3 %v3821_v4  ;;  %1641 = vmatmul.bf16.vlgmr.msra.gmra.mxu0 %v5653_v51  ;;  %v3344_v4 = vld [vmem:[%s6777_s1 + $0x48] sm:$0xf]  ;;  %v4737_v31 = vld [vmem:[%s6777_s1 + $0x14] sm:$0xf0]  ;;  %v3457_v40 = vor.u32 %v4773_v27, %v3456_v26  ;;  %v3410_v2 = vld [vmem:[%s6777_s1 + $0xd8] sm:$0xf0] }
  0x81   : > { %1678 = vmatpush.bf16.msrb.mxu2 %v3965_v60  ;;  %1724 = vmatpush.bf16.msrb.mxu0 %v3681_v12  ;;  %v4813_v60 = vld [vmem:[%s6777_s1 + $0x274] sm:$0xf0]  ;;  %v4064_v52 = vld [vmem:[%s6777_s1 + $0x5e8] sm:$0xf]  ;;  %v3522_v23 = vld [vmem:[%s6777_s1 + $0x1b8] sm:$0xf0] }
  0x82   : > { %1698 = vmatpush.bf16.msrb.mxu1 %v3425_v5  ;;  %v3617_v3 = vor.u32 %v4813_v60, %v3616_v59  ;;  %v4745_v5 = vld [vmem:[%s6777_s1 + $0x54] sm:$0xf0]  ;;  %v3920_v54 = vld [vmem:[%s6777_s1 + $0x4c8] sm:$0xf]  ;;  %v4795_v60 = vld [vmem:[%s6777_s1 + $0x1ec] sm:$0xf] }
  0x83   : > { %1667 = vmatmul.bf16.vlgmr.msra.gmra.mxu3 %v5859_v30  ;;  %1654 = vmatmul.bf16.vlgmr.msra.gmra.mxu1 %v5666_v57  ;;  %v4841_v12 = vld [vmem:[%s6777_s1 + $0x354] sm:$0xf0]  ;;  %v3888_v20 = vld [vmem:[%s6777_s1 + $0x488] sm:$0xf]  ;;  %v4751_v26 = vld [vmem:[%s6777_s1 + $0x8c] sm:$0xf] }
  0x84   : > { %1692 = vmatpush.bf16.msrb.mxu3 %v4077_v9  ;;  %v4809_v9 = vld [vmem:[%s6777_s1 + $0x254] sm:$0xf0]  ;;  %v3378_v27 = vld [vmem:[%s6777_s1 + $0x98] sm:$0xf0]  ;;  %v3856_v47 = vld [vmem:[%s6777_s1 + $0x448] sm:$0xf] }
  0x85   : > { %1679 = vmatpush.bf16.msrb.mxu2 %v3949_v13  ;;  %1725 = vmatpush.bf16.msrb.mxu0 %v3665_v25  ;;  %v3345_v13 = vor.u32 %v4745_v5, %v3344_v4  ;;  %v3329_v25 = vor.u32 %v4741_v18, %v3328_v17  ;;  %v4893_v33 = vld [vmem:[%s6777_s1 + $0x4f4] sm:$0xf0]  ;;  %v4048_v5 = vld [vmem:[%s6777_s1 + $0x5c8] sm:$0xf] }
  0x86   : > { %1699 = vmatpush.bf16.msrb.mxu1 %v3409_v22  ;;  %v3473_v22 = vor.u32 %v4777_v15, %v3472_v14  ;;  %v4801_v38 = vld [vmem:[%s6777_s1 + $0x214] sm:$0xf0]  ;;  %v4755_v14 = vld [vmem:[%s6777_s1 + $0xac] sm:$0xf]  ;;  %v3394_v15 = vld [vmem:[%s6777_s1 + $0xb8] sm:$0xf0] }
  0x87   : > { %v4833_v41 = vld [vmem:[%s6777_s1 + $0x314] sm:$0xf0]  ;;  %v3569_v50 = vor.u32 %v4801_v38, %v3568_v37  ;;  %v4032_v18 = vld [vmem:[%s6777_s1 + $0x5a8] sm:$0xf]  ;;  %v3397_v24 = vor.u32 %v4755_v14, %v3394_v15  ;;  %v3506_v37 = vld [vmem:[%s6777_s1 + $0x198] sm:$0xf0]  ;;  %v3381_v38 = vor.u32 %v4751_v26, %v3378_v27 }
  0x88   : > { %1711 = vmatpush.bf16.msra.mxu3 %v3553_v19  ;;  %1680 = vmatmul.bf16.vlgmr.msrb.gmra.mxu2 %v5870_v35  ;;  %v3729_v19 = vor.u32 %v4841_v12, %v3728_v11  ;;  %v4929_v43 = vld [vmem:[%s6777_s1 + $0x614] sm:$0xf0]  ;;  %v3538_v11 = vld [vmem:[%s6777_s1 + $0x1d8] sm:$0xf0]  ;;  %v3413_v12 = vor.u32 %v4759_v1, %v3410_v2 }
  0x89   : > { %1737 = vmatpush.bf16.msra.mxu2 %v3809_v16  ;;  %1726 = vmatpush.bf16.msrb.mxu0 %v3649_v39  ;;  %v3601_v16 = vor.u32 %v4809_v9, %v3600_v8  ;;  %v3696_v39 = vld [vmem:[%s6777_s1 + $0x308] sm:$0xf]  ;;  %v4885_v9 = vld [vmem:[%s6777_s1 + $0x4b4] sm:$0xf0]  ;;  %v3474_v1 = vld [vmem:[%s6777_s1 + $0x158] sm:$0xf0] }
  0x8a   : > { %1700 = vmatpush.bf16.msrb.mxu1 %v3393_v36  ;;  %v3440_v36 = vld [vmem:[%s6777_s1 + $0x108] sm:$0xf]  ;;  %v3697_v56 = vor.u32 %v4833_v41, %v3696_v39  ;;  %v4881_v21 = vld [vmem:[%s6777_s1 + $0x494] sm:$0xf0]  ;;  %v3362_v41 = vld [vmem:[%s6777_s1 + $0x78] sm:$0xf0] }
  0x8b   : > { %v3904_v8 = vld [vmem:[%s6777_s1 + $0x4a8] sm:$0xf]  ;;  %v4873_v48 = vld [vmem:[%s6777_s1 + $0x454] sm:$0xf0]  ;;  %v3458_v14 = vld [vmem:[%s6777_s1 + $0x138] sm:$0xf0] }
  0x8c   : > { %1712 = vmatpush.bf16.msra.mxu3 %v3537_v32  ;;  %v3936_v32 = vld [vmem:[%s6777_s1 + $0x4e8] sm:$0xf]  ;;  %v3810_v26 = vld [vmem:[%s6777_s1 + $0x3f8] sm:$0xf0] }
  0x8d   : > { %1738 = vmatpush.bf16.msra.mxu2 %v3793_v28  ;;  %1727 = vmatpush.bf16.msrb.mxu0 %v3633_v53  ;;  %v3312_v28 = vld [vmem:[%s6777_s1 + $0x8] sm:$0xf]  ;;  %v4925_v53 = vld [vmem:[%s6777_s1 + $0x5f4] sm:$0xf0] }
  0x8e   : > { %1701 = vmatpush.bf16.msrb.mxu1 %v3377_v49  ;;  %v3313_v44 = vor.u32 %v4737_v31, %v3312_v28  ;;  %v3937_v49 = vor.u32 %v4893_v33, %v3936_v32  ;;  %v3889_v28 = vor.u32 %v4881_v21, %v3888_v20  ;;  %v4016_v31 = vld [vmem:[%s6777_s1 + $0x588] sm:$0xf]  ;;  %v4913_v32 = vld [vmem:[%s6777_s1 + $0x594] sm:$0xf0]  ;;  %v4735_v20 = vld [vmem:[%s6777_s1 + $0xc] sm:$0xf] }
  0x8f   : > { %v3872_v33 = vld [vmem:[%s6777_s1 + $0x468] sm:$0xf]  ;;  %v4017_v39 = vor.u32 %v4913_v32, %v4016_v31  ;;  %v3314_v21 = vld [vmem:[%s6777_s1 + $0x18] sm:$0xf0]  ;;  %v4823_v31 = vld [vmem:[%s6777_s1 + $0x2cc] sm:$0xf] }
  0x90   : > { %1713 = vmatpush.bf16.msra.mxu3 %v3521_v46  ;;  %v4769_v46 = vld [vmem:[%s6777_s1 + $0x114] sm:$0xf0]  ;;  %v3317_v32 = vor.u32 %v4735_v20, %v3314_v21  ;;  %v3746_v21 = vld [vmem:[%s6777_s1 + $0x378] sm:$0xf0] }
  0x91   : > { %1739 = vmatpush.bf16.msra.mxu2 %v3777_v42  ;;  %1728 = vmatpush.bf16.msrb.mxu0 %v3617_v3  ;;  %v4080_v42 = vld [vmem:[%s6777_s1 + $0x608] sm:$0xf]  ;;  %v3441_v62 = vor.u32 %v4769_v46, %v3440_v36  ;;  %v4783_v36 = vld [vmem:[%s6777_s1 + $0x18c] sm:$0xf]  ;;  %v4909_v46 = vld [vmem:[%s6777_s1 + $0x574] sm:$0xf0] }
  0x92   : > { %1702 = vmatpush.bf16.msrb.mxu1 %v3361_v0  ;;  %v4081_v59 = vor.u32 %v4929_v43, %v4080_v42  ;;  %v4065_v0 = vor.u32 %v4925_v53, %v4064_v52  ;;  %v3509_v43 = vor.u32 %v4783_v36, %v3506_v37  ;;  %v3442_v36 = vld [vmem:[%s6777_s1 + $0x118] sm:$0xf0] }
  0x93   : > { %4087 = vmatmul.msk.bf16.vlgmr.msrb.gmra.mxu3 %vm1512_vm0, %v5772_v45 }
  0x94   : > { %1714 = vmatpush.bf16.msra.mxu3 %v3505_v61  ;;  %v3554_v61 = vld [vmem:[%s6777_s1 + $0x1f8] sm:$0xf0] }
  0x95   : > { %1740 = vmatpush.bf16.msra.mxu2 %v3761_v58  ;;  %1729 = vmatpush.bf16.msrb.mxu0 %v3601_v16  ;;  %v4889_v58 = vld [vmem:[%s6777_s1 + $0x4d4] sm:$0xf0]  ;;  %v3557_v4 = vor.u32 %v4795_v60, %v3554_v61  ;;  %v3905_v16 = vor.u32 %v4885_v9, %v3904_v8  ;;  %v3984_v60 = vld [vmem:[%s6777_s1 + $0x548] sm:$0xf] }
  0x96   : > { %1703 = vmatpush.bf16.msrb.mxu1 %v3345_v13  ;;  %v3921_v3 = vor.u32 %v4889_v58, %v3920_v54  ;;  %v4743_v54 = vld [vmem:[%s6777_s1 + $0x4c] sm:$0xf]  ;;  %v3857_v58 = vor.u32 %v4873_v48, %v3856_v47  ;;  %v4905_v61 = vld [vmem:[%s6777_s1 + $0x554] sm:$0xf0]  ;;  %v3968_v9 = vld [vmem:[%s6777_s1 + $0x528] sm:$0xf] }
  0x97   : > { %v4887_v47 = vld [vmem:[%s6777_s1 + $0x4cc] sm:$0xf]  ;;  %v3922_v48 = vld [vmem:[%s6777_s1 + $0x4d8] sm:$0xf0] }
  0x98   : > { %1715 = vmatpush.bf16.msra.mxu3 %v3489_v10  ;;  %v4791_v10 = vld [vmem:[%s6777_s1 + $0x1cc] sm:$0xf] }
  0x99   : > { %1741 = vmatpush.bf16.msra.mxu2 %v3745_v6  ;;  %1730 = vmatpush.bf16.msrb.mxu0 %v3585_v29  ;;  %v4921_v6 = vld [vmem:[%s6777_s1 + $0x5d4] sm:$0xf0]  ;;  %v3541_v17 = vor.u32 %v4791_v10, %v3538_v11  ;;  %v3824_v11 = vld [vmem:[%s6777_s1 + $0x408] sm:$0xf] }
  0x9a   : > { %1704 = vmatpush.bf16.msrb.mxu1 %v3329_v25  ;;  %v4049_v13 = vor.u32 %v4921_v6, %v4048_v5  ;;  %v3330_v5 = vld [vmem:[%s6777_s1 + $0x38] sm:$0xf0]  ;;  %v4901_v10 = vld [vmem:[%s6777_s1 + $0x534] sm:$0xf0] }
  0x9c   : > { %1716 = vmatpush.bf16.msra.mxu3 %v3473_v22  ;;  %v4787_v22 = vld [vmem:[%s6777_s1 + $0x1ac] sm:$0xf] }
  0x9d   : > { %1742 = vmatpush.bf16.msra.mxu2 %v3729_v19  ;;  %1731 = vmatpush.bf16.msrb.mxu0 %v3569_v50  ;;  %v4917_v19 = vld [vmem:[%s6777_s1 + $0x5b4] sm:$0xf0]  ;;  %v3525_v29 = vor.u32 %v4787_v22, %v3522_v23  ;;  %v3490_v50 = vld [vmem:[%s6777_s1 + $0x178] sm:$0xf0] }
  0x9e   : > { %1705 = vmatpush.bf16.msrb.mxu1 %v3313_v44  ;;  %v4033_v25 = vor.u32 %v4917_v19, %v4032_v18  ;;  %v4000_v44 = vld [vmem:[%s6777_s1 + $0x568] sm:$0xf]  ;;  %v3969_v18 = vor.u32 %v4901_v10, %v3968_v9  ;;  %v4879_v10 = vld [vmem:[%s6777_s1 + $0x48c] sm:$0xf] }
  0x9f   : > { %v4001_v53 = vor.u32 %v4909_v46, %v4000_v44  ;;  %v3952_v19 = vld [vmem:[%s6777_s1 + $0x508] sm:$0xf]  ;;  %v3794_v46 = vld [vmem:[%s6777_s1 + $0x3d8] sm:$0xf0] }
  0xa0   : > { %1717 = vmatpush.bf16.msra.mxu3 %v3457_v40  ;;  %1732 = vmatmul.bf16.vlgmr.msrb.gmra.mxu0 %v5653_v51  ;;  %v4747_v40 = vld [vmem:[%s6777_s1 + $0x6c] sm:$0xf] }
  0xa1   : > { %1743 = vmatpush.bf16.msra.mxu2 %v3713_v34  ;;  %1783 = vmatpush.bf16.msra.mxu0 %v4081_v59  ;;  %v4877_v34 = vld [vmem:[%s6777_s1 + $0x474] sm:$0xf0]  ;;  %v3365_v52 = vor.u32 %v4747_v40, %v3362_v41 }
  0xa2   : > { %1750 = vmatpush.bf16.msra.mxu1 %v3937_v49  ;;  %v3873_v42 = vor.u32 %v4877_v34, %v3872_v33  ;;  %v4779_v49 = vld [vmem:[%s6777_s1 + $0x16c] sm:$0xf]  ;;  %v3666_v33 = vld [vmem:[%s6777_s1 + $0x2d8] sm:$0xf0] }
  0xa3   : > { %1706 = vmatmul.bf16.vlgmr.msrb.gmra.mxu1 %v5664_v55  ;;  %v3493_v59 = vor.u32 %v4779_v49, %v3490_v50  ;;  %v4767_v34 = vld [vmem:[%s6777_s1 + $0x10c] sm:$0xf] }
  0xa4   : > { %1718 = vmatpush.bf16.msra.mxu3 %v3441_v62  ;;  %v3840_v62 = vld [vmem:[%s6777_s1 + $0x428] sm:$0xf]  ;;  %v3445_v44 = vor.u32 %v4767_v34, %v3442_v36  ;;  %v4819_v50 = vld [vmem:[%s6777_s1 + $0x2ac] sm:$0xf] }
  0xa5   : > { %1744 = vmatpush.bf16.msra.mxu2 %v3697_v56  ;;  %1802 = vmatpush.bf16.msrb.mxu0 %v3557_v4  ;;  %v3346_v56 = vld [vmem:[%s6777_s1 + $0x58] sm:$0xf0]  ;;  %v4739_v4 = vld [vmem:[%s6777_s1 + $0x2c] sm:$0xf] }
  0xa6   : > { %1751 = vmatpush.bf16.msra.mxu1 %v3921_v3  ;;  %v3349_v2 = vor.u32 %v4743_v54, %v3346_v56  ;;  %v3985_v3 = vor.u32 %v4905_v61, %v3984_v60  ;;  %v3333_v15 = vor.u32 %v4739_v4, %v3330_v5  ;;  %v4050_v54 = vld [vmem:[%s6777_s1 + $0x5d8] sm:$0xf0]  ;;  %v4839_v34 = vld [vmem:[%s6777_s1 + $0x34c] sm:$0xf] }
  0xa7   : > { %1719 = vmatmul.bf16.vlgmr.msra.gmra.mxu3 %v5695_v7  ;;  %v3778_v61 = vld [vmem:[%s6777_s1 + $0x3b8] sm:$0xf0] }
  0xa8   : > { %1763 = vmatpush.bf16.msrb.mxu3 %v4065_v0  ;;  %1745 = vmatmul.bf16.vlgmr.msra.gmra.mxu2 %v5666_v57  ;;  %v4775_v0 = vld [vmem:[%s6777_s1 + $0x14c] sm:$0xf]  ;;  %v4034_v4 = vld [vmem:[%s6777_s1 + $0x5b8] sm:$0xf0] }
  0xa9   : > { %1789 = vmatpush.bf16.msrb.mxu2 %v3429_v63  ;;  %1803 = vmatpush.bf16.msrb.mxu0 %v3541_v17  ;;  %v4869_v63 = vld [vmem:[%s6777_s1 + $0x434] sm:$0xf0]  ;;  %v3477_v8 = vor.u32 %v4775_v0, %v3474_v1  ;;  %v3682_v17 = vld [vmem:[%s6777_s1 + $0x2f8] sm:$0xf0]  ;;  %v4815_v1 = vld [vmem:[%s6777_s1 + $0x28c] sm:$0xf] }
  0xaa   : > { %1752 = vmatpush.bf16.msra.mxu1 %v3905_v16  ;;  %v3841_v6 = vor.u32 %v4869_v63, %v3840_v62  ;;  %v4827_v16 = vld [vmem:[%s6777_s1 + $0x2ec] sm:$0xf]  ;;  %v3906_v63 = vld [vmem:[%s6777_s1 + $0x4b8] sm:$0xf0] }
  0xab   : > { %v3685_v27 = vor.u32 %v4827_v16, %v3682_v17  ;;  %v4883_v62 = vld [vmem:[%s6777_s1 + $0x4ac] sm:$0xf] }
  0xac   : > { %1764 = vmatpush.bf16.msrb.mxu3 %v4049_v13  ;;  %v4771_v13 = vld [vmem:[%s6777_s1 + $0x12c] sm:$0xf] }
  0xad   : > { %1790 = vmatpush.bf16.msrb.mxu2 %v3413_v12  ;;  %1804 = vmatpush.bf16.msrb.mxu0 %v3525_v29  ;;  %v4865_v12 = vld [vmem:[%s6777_s1 + $0x414] sm:$0xf0]  ;;  %v3461_v23 = vor.u32 %v4771_v13, %v3458_v14  ;;  %v3938_v29 = vld [vmem:[%s6777_s1 + $0x4f8] sm:$0xf0]  ;;  %v4811_v13 = vld [vmem:[%s6777_s1 + $0x26c] sm:$0xf] }
  0xae   : > { %1753 = vmatpush.bf16.msra.mxu1 %v3889_v28  ;;  %v3825_v22 = vor.u32 %v4865_v12, %v3824_v11  ;;  %v4891_v28 = vld [vmem:[%s6777_s1 + $0x4ec] sm:$0xf]  ;;  %v3890_v11 = vld [vmem:[%s6777_s1 + $0x498] sm:$0xf0] }
  0xaf   : > { %v3941_v41 = vor.u32 %v4891_v28, %v3938_v29  ;;  %v3618_v14 = vld [vmem:[%s6777_s1 + $0x278] sm:$0xf0]  ;;  %v4911_v16 = vld [vmem:[%s6777_s1 + $0x58c] sm:$0xf] }
  0xb0   : > { %1765 = vmatpush.bf16.msrb.mxu3 %v4033_v25  ;;  %4088 = vmatmul.msk.bf16.vlgmr.msra.gmra.mxu0 %vm1512_vm0, %v5772_v45  ;;  %v4859_v25 = vld [vmem:[%s6777_s1 + $0x3ec] sm:$0xf]  ;;  %v3621_v20 = vor.u32 %v4811_v13, %v3618_v14  ;;  %v4002_v29 = vld [vmem:[%s6777_s1 + $0x578] sm:$0xf0]  ;;  %v4204_v13 = vld [vmem:[#allocation2 + $0xe0] sm:$0xf] }
  0xb1   : > { %1791 = vmatpush.bf16.msrb.mxu2 %v3397_v24  ;;  %1805 = vmatpush.bf16.msrb.mxu0 %v3509_v43  ;;  %v4897_v24 = vld [vmem:[%s6777_s1 + $0x514] sm:$0xf0]  ;;  %v3813_v40 = vor.u32 %v4859_v25, %v3810_v26  ;;  %v3669_v43 = vor.u32 %v4823_v31, %v3666_v33  ;;  %v4807_v26 = vld [vmem:[%s6777_s1 + $0x24c] sm:$0xf]  ;;  %v4960_v14 = vld [vmem:[#allocation2 + $0xec] sm:$0xf0] }
  0xb2   : > { %1754 = vmatpush.bf16.msra.mxu1 %v3873_v42  ;;  %v3953_v37 = vor.u32 %v4897_v24, %v3952_v19  ;;  %v4855_v42 = vld [vmem:[%s6777_s1 + $0x3cc] sm:$0xf] }
  0xb3   : > { %v3797_v56 = vor.u32 %v4855_v42, %v3794_v46  ;;  %v4843_v19 = vld [vmem:[%s6777_s1 + $0x36c] sm:$0xf] }
  0xb4   : > { %1766 = vmatpush.bf16.msrb.mxu3 %v4017_v39  ;;  %v4066_v39 = vld [vmem:[%s6777_s1 + $0x5f8] sm:$0xf0]  ;;  %v4907_v28 = vld [vmem:[%s6777_s1 + $0x56c] sm:$0xf] }
  0xb5   : > { %1792 = vmatpush.bf16.msrb.mxu2 %v3381_v38  ;;  %1806 = vmatpush.bf16.msrb.mxu0 %v3493_v59  ;;  %v4923_v38 = vld [vmem:[%s6777_s1 + $0x5ec] sm:$0xf] }
  0xb6   : > { %1755 = vmatpush.bf16.msra.mxu1 %v3857_v58  ;;  %v4069_v49 = vor.u32 %v4923_v38, %v4066_v39  ;;  %v3925_v58 = vor.u32 %v4887_v47, %v3922_v48  ;;  %v4851_v59 = vld [vmem:[%s6777_s1 + $0x3ac] sm:$0xf]  ;;  %v3730_v38 = vld [vmem:[%s6777_s1 + $0x358] sm:$0xf0] }
  0xb7   : > { %v3781_v5 = vor.u32 %v4851_v59, %v3778_v61  ;;  %v4871_v39 = vld [vmem:[%s6777_s1 + $0x44c] sm:$0xf]  ;;  %v3986_v47 = vld [vmem:[%s6777_s1 + $0x558] sm:$0xf0]  ;;  %v3733_v48 = vor.u32 %v4839_v34, %v3730_v38  ;;  %v4172_v38 = vld [vmem:[#allocation2 + $0xa0] sm:$0xf] }
  0xb8   : > { %1767 = vmatpush.bf16.msrb.mxu3 %v4001_v53  ;;  %v4919_v53 = vld [vmem:[%s6777_s1 + $0x5cc] sm:$0xf] }
  0xb9   : > { %1793 = vmatpush.bf16.msrb.mxu2 %v3365_v52  ;;  %1807 = vmatpush.bf16.msrb.mxu0 %v3477_v8  ;;  %v3650_v52 = vld [vmem:[%s6777_s1 + $0x2b8] sm:$0xf0]  ;;  %v4053_v0 = vor.u32 %v4919_v53, %v4050_v54  ;;  %v4847_v8 = vld [vmem:[%s6777_s1 + $0x38c] sm:$0xf] }
  0xba   : > { %1756 = vmatpush.bf16.msra.mxu1 %v3841_v6  ;;  %v3653_v60 = vor.u32 %v4819_v50, %v3650_v52  ;;  %v3909_v6 = vor.u32 %v4883_v62, %v3906_v63  ;;  %v4803_v42 = vld [vmem:[%s6777_s1 + $0x22c] sm:$0xf]  ;;  %v3714_v53 = vld [vmem:[%s6777_s1 + $0x338] sm:$0xf0] }
  0xbb   : > { %v4903_v46 = vld [vmem:[%s6777_s1 + $0x54c] sm:$0xf]  ;;  %v3970_v63 = vld [vmem:[%s6777_s1 + $0x538] sm:$0xf0] }
  0xbc   : > { %1768 = vmatpush.bf16.msrb.mxu3 %v3985_v3  ;;  %v4915_v3 = vld [vmem:[%s6777_s1 + $0x5ac] sm:$0xf] }
  0xbd   : > { %1794 = vmatpush.bf16.msrb.mxu2 %v3349_v2  ;;  %1808 = vmatpush.bf16.msrb.mxu0 %v3461_v23  ;;  %v3634_v2 = vld [vmem:[%s6777_s1 + $0x298] sm:$0xf0]  ;;  %v4037_v12 = vor.u32 %v4915_v3, %v4034_v4  ;;  %v4835_v50 = vld [vmem:[%s6777_s1 + $0x32c] sm:$0xf] }
  0xbe   : > { %1757 = vmatpush.bf16.msra.mxu1 %v3825_v22  ;;  %v3637_v9 = vor.u32 %v4815_v1, %v3634_v2  ;;  %v4875_v22 = vld [vmem:[%s6777_s1 + $0x46c] sm:$0xf]  ;;  %v3874_v23 = vld [vmem:[%s6777_s1 + $0x478] sm:$0xf0]  ;;  %v6560_v25 = vpop.f32.mrf.mxu1  ;;  %v6635_v2 = vld [vmem:[%s6778_s2] sm:$0xf]  ;;  %v3717_v4 = vor.u32 %v4835_v50, %v3714_v53 }
  0xbf   : > { %v3877_v33 = vor.u32 %v4875_v22, %v3874_v23  ;;  %v4867_v54 = vld [vmem:[%s6777_s1 + $0x42c] sm:$0xf]  ;;  %v4082_v1 = vld [vmem:[%s6777_s1 + $0x618] sm:$0xf0]  ;;  %v4205_v23 = vor.u32 %v4960_v14, %v4204_v13  ;;  %v4092_v13 = vld [vmem:[#allocation2] sm:$0xf] }
  0xc0   : > { %1769 = vmatpush.bf16.msrb.mxu3 %v3969_v18  ;;  %v3893_v18 = vor.u32 %v4879_v10, %v3890_v11  ;;  %v4799_v59 = vld [vmem:[%s6777_s1 + $0x20c] sm:$0xf]  ;;  %v3826_v10 = vld [vmem:[%s6777_s1 + $0x418] sm:$0xf0]  ;;  %v4932_v14 = vld [vmem:[#allocation2 + $0xc] sm:$0xf0] }
  0xc1   : > { %1795 = vmatpush.bf16.msrb.mxu2 %v3333_v15  ;;  %1758 = vmatmul.bf16.vlgmr.msra.gmra.mxu1 %v5859_v30  ;;  %v6540_v15 = vpop.f32.mrf.mxu0  ;;  %v4899_v61 = vld [vmem:[%s6777_s1 + $0x52c] sm:$0xf] }
  0xc2   : > { %1815 = vmatpush.bf16.msrb.mxu1 %v3685_v27  ;;  %1809 = vmatpush.bf16.msrb.mxu0 %v3445_v44  ;;  %v3602_v27 = vld [vmem:[%s6777_s1 + $0x258] sm:$0xf0] }
  0xc3   : > { %v3605_v36 = vor.u32 %v4807_v26, %v3602_v27  ;;  %v4188_v26 = vld [vmem:[#allocation2 + $0xc0] sm:$0xf]  ;;  %v4956_v27 = vld [vmem:[#allocation2 + $0xcc] sm:$0xf0] }
  0xc4   : > { %1770 = vmatpush.bf16.msrb.mxu3 %v3953_v37 }
  0xc5   : > { %1796 = vmatpush.bf16.msrb.mxu2 %v3317_v32  ;;  %1810 = vmatmul.bf16.vlgmr.msrb.gmra.mxu0 %v5695_v7  ;;  %v4018_v7 = vld [vmem:[%s6777_s1 + $0x598] sm:$0xf0]  ;;  %v3749_v32 = vor.u32 %v4843_v19, %v3746_v21  ;;  %v4992_v19 = vld [vmem:[#allocation2 + $0x1ec] sm:$0xf0] }
  0xc6   : > { %1816 = vmatpush.bf16.msrb.mxu1 %v3669_v43  ;;  %1854 = vmatpush.bf16.msra.mxu0 %v4069_v49  ;;  %v4021_v24 = vor.u32 %v4911_v16, %v4018_v7  ;;  %v6574_v31 = vpop.f32.mrf.mxu2  ;;  %v6579_v37 = vpop.f32.mrf.mxu3  ;;  %v3586_v43 = vld [vmem:[%s6777_s1 + $0x238] sm:$0xf0]  ;;  %v4895_v16 = vld [vmem:[%s6777_s1 + $0x50c] sm:$0xf] }
  0xc7   : > { %1771 = vmatmul.bf16.vlgmr.msrb.gmra.mxu3 %v5870_v35  ;;  %v3589_v52 = vor.u32 %v4803_v42, %v3586_v43  ;;  %v1540_v62 = vpop.f32.mrf.mxu1  ;;  %v4984_v42 = vld [vmem:[#allocation2 + $0x1ac] sm:$0xf0] }
  0xc8   : > { %1828 = vmatpush.bf16.msra.mxu3 %v3813_v40  ;;  %1797 = vmatmul.bf16.vlgmr.msrb.gmra.mxu2 %v5664_v55  ;;  %v3762_v55 = vld [vmem:[%s6777_s1 + $0x398] sm:$0xf0]  ;;  %v4940_v62 = vld [vmem:[#allocation2 + $0x4c] sm:$0xf0] }
  0xc9   : > { %1841 = vmatpush.bf16.msra.mxu2 %v3941_v41  ;;  %v3765_v17 = vor.u32 %v4847_v8, %v3762_v55  ;;  %v3858_v40 = vld [vmem:[%s6777_s1 + $0x458] sm:$0xf0]  ;;  %v4005_v41 = vor.u32 %v4907_v28, %v4002_v29  ;;  %v1527_v44 = vpop.f32.mrf.mxu0  ;;  %v4863_v55 = vld [vmem:[%s6777_s1 + $0x40c] sm:$0xf]  ;;  %v4316_v29 = vld [vmem:[#allocation2 + $0x1c0] sm:$0xf] }
  0xca   : > { %1817 = vmatpush.bf16.msrb.mxu1 %v3653_v60  ;;  %1855 = vmatpush.bf16.msra.mxu0 %v4053_v0  ;;  %v3861_v49 = vor.u32 %v4871_v39, %v3858_v40  ;;  %v3570_v60 = vld [vmem:[%s6777_s1 + $0x218] sm:$0xf0]  ;;  %v4927_v0 = vld [vmem:[%s6777_s1 + $0x60c] sm:$0xf]  ;;  %v3829_v22 = vor.u32 %v4863_v55, %v3826_v10  ;;  %v4952_v39 = vld [vmem:[#allocation2 + $0xac] sm:$0xf0] }
  0xcb   : > { %v3573_v8 = vor.u32 %v4799_v59, %v3570_v60  ;;  %v4085_v7 = vor.u32 %v4927_v0, %v4082_v1  ;;  %v4948_v44 = vld [vmem:[#allocation2 + $0x8c] sm:$0xf0]  ;;  %v4252_v0 = vld [vmem:[#allocation2 + $0x140] sm:$0xf] }
  0xcc   : > { %1829 = vmatpush.bf16.msra.mxu3 %v3797_v56  ;;  %v3842_v56 = vld [vmem:[%s6777_s1 + $0x438] sm:$0xf0]  ;;  %v4972_v1 = vld [vmem:[#allocation2 + $0x14c] sm:$0xf0]  ;;  %v4236_v10 = vld [vmem:[#allocation2 + $0x120] sm:$0xf] }
  0xcd   : > { %1842 = vmatpush.bf16.msra.mxu2 %v3925_v58  ;;  %v3989_v58 = vor.u32 %v4903_v46, %v3986_v47  ;;  %v4253_v55 = vor.u32 %v4972_v1, %v4252_v0  ;;  %v5008_v0 = vld [vmem:[#allocation2 + $0x26c] sm:$0xf0]  ;;  %v525_v1 = vperm.slane %v6635_v2, 1 }
  0xce   : > { %1818 = vmatpush.bf16.msrb.mxu1 %v3637_v9  ;;  %1856 = vmatpush.bf16.msra.mxu0 %v4037_v12  ;;  %v1553_v3 = vpop.f32.mrf.mxu2  ;;  %v3698_v9 = vld [vmem:[%s6777_s1 + $0x318] sm:$0xf0]  ;;  %v1566_v11 = vpop.f32.mrf.mxu3  ;;  %v3973_v12 = vor.u32 %v4899_v61, %v3970_v63  ;;  %v4124_v61 = vld [vmem:[#allocation2 + $0x40] sm:$0xf] }
  0xcf   : > { %v4968_v11 = vld [vmem:[#allocation2 + $0x12c] sm:$0xf0] }
  0xd0   : > { %1830 = vmatpush.bf16.msra.mxu3 %v3781_v5  ;;  %v3845_v5 = vor.u32 %v4867_v54, %v3842_v56  ;;  %v4944_v54 = vld [vmem:[#allocation2 + $0x6c] sm:$0xf0]  ;;  %v4268_v56 = vld [vmem:[#allocation2 + $0x160] sm:$0xf] }
  0xd1   : > { %1843 = vmatpush.bf16.msra.mxu2 %v3909_v6  ;;  %v4831_v6 = vld [vmem:[%s6777_s1 + $0x30c] sm:$0xf] }
  0xd2   : > { %1819 = vmatpush.bf16.msrb.mxu1 %v3621_v20  ;;  %1857 = vmatpush.bf16.msra.mxu0 %v4021_v24  ;;  %v524_v20 = vperm.slane %v6635_v2, 0  ;;  %v3701_v21 = vor.u32 %v4831_v6, %v3698_v9  ;;  %v4936_v9 = vld [vmem:[#allocation2 + $0x2c] sm:$0xf0] }
  0xd4   : > { %1831 = vmatpush.bf16.msra.mxu3 %v3765_v17  ;;  %v3954_v17 = vld [vmem:[%s6777_s1 + $0x518] sm:$0xf0] }
  0xd5   : > { %1844 = vmatpush.bf16.msra.mxu2 %v3893_v18  ;;  %v4332_v18 = vld [vmem:[#allocation2 + $0x1e0] sm:$0xf]  ;;  %v3957_v24 = vor.u32 %v4895_v16, %v3954_v17 }
  0xd6   : > { %1820 = vmatpush.bf16.msrb.mxu1 %v3605_v36  ;;  %1858 = vmatpush.bf16.msra.mxu0 %v4005_v41  ;;  %v4333_v28 = vor.u32 %v4992_v19, %v4332_v18  ;;  %v6658_v34 = vpop.f32.mrf.mxu2  ;;  %v4189_v36 = vor.u32 %v4956_v27, %v4188_v26  ;;  %v4300_v41 = vld [vmem:[#allocation2 + $0x1a0] sm:$0xf]  ;;  %v5024_v18 = vld [vmem:[#allocation2 + $0x2ec] sm:$0xf0]  ;;  %v4334_v26 = vld [vmem:[#allocation2 + $0x1f0] sm:$0xf0]  ;;  %v4093_v27 = vor.u32 %v4932_v14, %v4092_v13 }
  0xd7   : > { %v4301_v46 = vor.u32 %v4984_v42, %v4300_v41  ;;  %v4460_v17 = vld [vmem:[#allocation2 + $0x2e0] sm:$0xf]  ;;  %v4986_v42 = vld [vmem:[#allocation2 + $0x1c4] sm:$0xf] }
  0xd8   : > { %1832 = vmatpush.bf16.msra.mxu3 %v3749_v32  ;;  %v4988_v32 = vld [vmem:[#allocation2 + $0x1cc] sm:$0xf0]  ;;  %v4938_v14 = vld [vmem:[#allocation2 + $0x44] sm:$0xf] }
  0xd9   : > { %1845 = vmatpush.bf16.msra.mxu2 %v3877_v33  ;;  %v1526_v33 = vadd.f32 %v6540_v15, %v524_v20  ;;  %v4317_v40 = vor.u32 %v4988_v32, %v4316_v29  ;;  %v4156_v15 = vld [vmem:[#allocation2 + $0x80] sm:$0xf]  ;;  %v4206_v20 = vld [vmem:[#allocation2 + $0xf0] sm:$0xf0] }
  0xda   : > { %1821 = vmatpush.bf16.msrb.mxu1 %v3589_v52  ;;  %1859 = vmatpush.bf16.msra.mxu0 %v3989_v58  ;;  %v4157_v53 = vor.u32 %v4948_v44, %v4156_v15  ;;  %v4428_v44 = vld [vmem:[#allocation2 + $0x2a0] sm:$0xf] }
  0xdb   : > { %v1539_v43 = vadd.f32 %v6560_v25, %v1526_v33  ;;  %v4140_v25 = vld [vmem:[#allocation2 + $0x60] sm:$0xf] }
  0xdc   : > { %1833 = vmatpush.bf16.msra.mxu3 %v3733_v48  ;;  %v4284_v48 = vld [vmem:[#allocation2 + $0x180] sm:$0xf]  ;;  %v4141_v59 = vor.u32 %v4944_v54, %v4140_v25  ;;  %v5012_v54 = vld [vmem:[#allocation2 + $0x28c] sm:$0xf0] }
  0xdd   : > { %1846 = vmatpush.bf16.msra.mxu2 %v3861_v49  ;;  %v1577_v47 = vpop.f32.mrf.mxu0  ;;  %v4980_v49 = vld [vmem:[#allocation2 + $0x18c] sm:$0xf0]  ;;  %v1552_v50 = vadd.f32 %v6574_v31, %v1539_v43  ;;  %v4318_v43 = vld [vmem:[#allocation2 + $0x1d0] sm:$0xf0]  ;;  %v4412_v25 = vld [vmem:[#allocation2 + $0x280] sm:$0xf] }
  0xde   : > { %1822 = vmatpush.bf16.msrb.mxu1 %v3573_v8  ;;  %1860 = vmatpush.bf16.msra.mxu0 %v3973_v12  ;;  %v1605_v52 = vpop.f32.mrf.mxu2  ;;  %v4108_v8 = vld [vmem:[#allocation2 + $0x20] sm:$0xf] }
  0xdf   : > { %v1565_v58 = vadd.f32 %v6579_v37, %v1552_v50  ;;  %v4109_v12 = vor.u32 %v4936_v9, %v4108_v8  ;;  %v4302_v52 = vld [vmem:[#allocation2 + $0x1b0] sm:$0xf0]  ;;  %v4974_v9 = vld [vmem:[#allocation2 + $0x164] sm:$0xf] }
  0xe0   : > { %1834 = vmatpush.bf16.msra.mxu3 %v3717_v4 }
  0xe1   : > { %1847 = vmatpush.bf16.msra.mxu2 %v3845_v5  ;;  %1823 = vmatmul.bf16.vlgmr.msrb.gmra.mxu1 %v5653_v51  ;;  %v4173_v51 = vor.u32 %v4952_v39, %v4172_v38  ;;  %v1578_v60 = vadd.f32 %v1577_v47, %v1565_v58  ;;  %v4125_v5 = vor.u32 %v4940_v62, %v4124_v61  ;;  %v4954_v38 = vld [vmem:[#allocation2 + $0xc4] sm:$0xf]  ;;  %v4190_v39 = vld [vmem:[#allocation2 + $0xd0] sm:$0xf0] }
  0xe2   : > { %1874 = vmatpush.bf16.msra.mxu1 %v4085_v7  ;;  %1861 = vmatpush.bf16.msra.mxu0 %v3957_v24  ;;  %v4237_v7 = vor.u32 %v4968_v11, %v4236_v10  ;;  %v4990_v24 = vld [vmem:[#allocation2 + $0x1e4] sm:$0xf]  ;;  %v4193_v15 = vor.u32 %v4954_v38, %v4190_v39  ;;  %v4413_v58 = vor.u32 %v5012_v54, %v4412_v25  ;;  %v4380_v11 = vld [vmem:[#allocation2 + $0x240] sm:$0xf] }
  0xe3   : > { %v4950_v47 = vld [vmem:[#allocation2 + $0xa4] sm:$0xf] }
  0xe4   : > { %1835 = vmatpush.bf16.msra.mxu3 %v3701_v21  ;;  %v4220_v21 = vld [vmem:[#allocation2 + $0x100] sm:$0xf]  ;;  %v4930_v38 = vld [vmem:[#allocation2 + $0x4] sm:$0xf] }
  0xe5   : > { %1848 = vmatpush.bf16.msra.mxu2 %v3829_v22  ;;  %1862 = vmatmul.bf16.vlgmr.msra.gmra.mxu0 %v5870_v35  ;;  %v4976_v35 = vld [vmem:[#allocation2 + $0x16c] sm:$0xf0]  ;;  %v1579_v3 = vpop.f32.mrf.mxu0 }
  0xe6   : > { %2679 = vmatpush.bf16.msrb.mxu1 %v4333_v28  ;;  %v4269_v63 = vor.u32 %v4976_v35, %v4268_v56  ;;  %v6666_v31 = vpop.f32.mrf.mxu3  ;;  %v4964_v22 = vld [vmem:[#allocation2 + $0x10c] sm:$0xf0]  ;;  %v4158_v56 = vld [vmem:[#allocation2 + $0x90] sm:$0xf0] }
  0xe7   : > { %1836 = vmatmul.bf16.vlgmr.msra.gmra.mxu3 %v5666_v57  ;;  %v1590_v57 = vpop.f32.mrf.mxu1  ;;  %v4221_v33 = vor.u32 %v4964_v22, %v4220_v21  ;;  %v1617_v13 = vadd.f32 %v6666_v31, %v525_v1 }
  0xe8   : > { %2666 = vmatpush.bf16.msrb.mxu3 %v4205_v23  ;;  %1849 = vmatmul.bf16.vlgmr.msra.gmra.mxu2 %v5859_v30  ;;  %v4285_v30 = vor.u32 %v4980_v49, %v4284_v48  ;;  %v1591_v37 = vadd.f32 %v1590_v57, %v1578_v60  ;;  %v4461_v23 = vor.u32 %v5024_v18, %v4460_v17  ;;  %v4174_v48 = vld [vmem:[#allocation2 + $0xb0] sm:$0xf0]  ;;  %v4982_v57 = vld [vmem:[#allocation2 + $0x1a4] sm:$0xf] }
  0xe9   : > { %v4321_v49 = vor.u32 %v4986_v42, %v4318_v43  ;;  %v4305_v35 = vor.u32 %v4982_v57, %v4302_v52  ;;  %v4286_v60 = vld [vmem:[#allocation2 + $0x190] sm:$0xf0]  ;;  %v4970_v18 = vld [vmem:[#allocation2 + $0x144] sm:$0xf]  ;;  %v4996_v42 = vld [vmem:[#allocation2 + $0x20c] sm:$0xf0] }
  0xea   : > { %2680 = vmatpush.bf16.msrb.mxu1 %v4317_v40  ;;  %v1604_v16 = vadd.f32 %v6658_v34, %v1591_v37  ;;  %2692 = vmatpush.bf16.msrb.mxu2 %v4461_v23  ;;  %v4444_v34 = vld [vmem:[#allocation2 + $0x2c0] sm:$0xf]  ;;  %v4337_v40 = vor.u32 %v4990_v24, %v4334_v26  ;;  %v5000_v24 = vld [vmem:[#allocation2 + $0x22c] sm:$0xf0]  ;;  %v4212_v43 = vld [vmem:[#allocation2 + $0xe8] sm:$0xf] }
  0xeb   : > { %v6670_v6 = vpop.f32.mrf.mxu2  ;;  %v4364_v23 = vld [vmem:[#allocation2 + $0x220] sm:$0xf] }
  0xec   : > { %2667 = vmatpush.bf16.msrb.mxu3 %v4189_v36  ;;  %v1880_v29 = vmax.f32 %v1604_v16, 0.0  ;;  %v5020_v36 = vld [vmem:[#allocation2 + $0x2cc] sm:$0xf0]  ;;  %v4126_v16 = vld [vmem:[#allocation2 + $0x50] sm:$0xf0]  ;;  %v1630_v26 = vadd.f32 %v6670_v6, %v1617_v13 }
  0xed   : > { %v4445_v41 = vor.u32 %v5020_v36, %v4444_v34  ;;  %v4129_v22 = vor.u32 %v4938_v14, %v4126_v16  ;;  %v4238_v34 = vld [vmem:[#allocation2 + $0x130] sm:$0xf0]  ;;  %v4340_v13 = vld [vmem:[#allocation2 + $0x1e8] sm:$0xf]  ;;  %v4993_v14 = vld [vmem:[#allocation2 + $0x1f4] sm:$0xf0] }
  0xee   : > { %2681 = vmatpush.bf16.msrb.mxu1 %v4301_v46  ;;  %v1618_v19 = vpop.f32.mrf.mxu3  ;;  %v5016_v46 = vld [vmem:[#allocation2 + $0x2ac] sm:$0xf0] }
  0xef   : > { %v1592_v4 = vpop.f32.mrf.mxu1  ;;  %2693 = vmatpush.bf16.msrb.mxu2 %v4445_v41  ;;  %v4429_v50 = vor.u32 %v5016_v46, %v4428_v44  ;;  %v4254_v19 = vld [vmem:[#allocation2 + $0x150] sm:$0xf0]  ;;  %v4348_v41 = vld [vmem:[#allocation2 + $0x200] sm:$0xf]  ;;  %v5022_v44 = vld [vmem:[#allocation2 + $0x2e4] sm:$0xf] }
  0xf0   : > { %2668 = vmatpush.bf16.msrb.mxu3 %v4173_v51  ;;  %v6673_v51 = vpack.c.bf16 %v1880_v29, %v1880_v29  ;;  %v4942_v4 = vld [vmem:[#allocation2 + $0x64] sm:$0xf]  ;;  %v4257_v31 = vor.u32 %v4970_v18, %v4254_v19  ;;  %v4349_v6 = vor.u32 %v4996_v42, %v4348_v41  ;;  %v4462_v46 = vld [vmem:[#allocation2 + $0x2f0] sm:$0xf0]  ;;  %v4949_v18 = vld [vmem:[#allocation2 + $0x94] sm:$0xf0] }
  0xf1   : > { %4089 = vmatmul.msk.bf16.vlgmr.msra.gmra.mxu1 %vm1512_vm0, %v5772_v45  ;;  %v4958_v45 = vld [vmem:[#allocation2 + $0xe4] sm:$0xf]  ;;  %v4465_v57 = vor.u32 %v5022_v44, %v4462_v46  ;;  %v4540_v42 = vld [vmem:[#allocation2 + $0x380] sm:$0xf] }
  0xf2   : > { %2682 = vmatpush.bf16.msrb.mxu1 %v4285_v30  ;;  %v4209_v32 = vor.u32 %v4958_v45, %v4206_v20  ;;  %v4946_v30 = vld [vmem:[#allocation2 + $0x84] sm:$0xf] }
  0xf3   : > { %v1631_v28 = vpop.f32.mrf.mxu2  ;;  %2694 = vmatpush.bf16.msrb.mxu2 %v4429_v50  ;;  %v4161_v62 = vor.u32 %v4946_v30, %v4158_v56  ;;  %v4222_v50 = vld [vmem:[#allocation2 + $0x110] sm:$0xf0]  ;;  %v4196_v56 = vld [vmem:[#allocation2 + $0xc8] sm:$0xf]  ;;  %v5010_v19 = vld [vmem:[#allocation2 + $0x284] sm:$0xf] }
  0xf4   : > { %2669 = vmatpush.bf16.msrb.mxu3 %v4157_v53  ;;  %v4177_v53 = vor.u32 %v4950_v47, %v4174_v48  ;;  %v4110_v28 = vld [vmem:[#allocation2 + $0x30] sm:$0xf0]  ;;  %v4961_v48 = vld [vmem:[#allocation2 + $0xf4] sm:$0xf0] }
  0xf5   : > { %v4213_v30 = vor.u32 %v4961_v48, %v4212_v43  ;;  %v5044_v43 = vld [vmem:[#allocation2 + $0x38c] sm:$0xf0]  ;;  %v4132_v48 = vld [vmem:[#allocation2 + $0x48] sm:$0xf] }
  0xf6   : > { %2683 = vmatpush.bf16.msrb.mxu1 %v4269_v63  ;;  %v4396_v63 = vld [vmem:[#allocation2 + $0x260] sm:$0xf]  ;;  %v4541_v44 = vor.u32 %v5044_v43, %v4540_v42  ;;  %v5054_v42 = vld [vmem:[#allocation2 + $0x3e4] sm:$0xf]  ;;  %v4590_v43 = vld [vmem:[#allocation2 + $0x3f0] sm:$0xf0] }
  0xf7   : > { %2695 = vmatpush.bf16.msrb.mxu2 %v4413_v58  ;;  %v4397_v8 = vor.u32 %v5008_v0, %v4396_v63  ;;  %v5018_v58 = vld [vmem:[#allocation2 + $0x2c4] sm:$0xf]  ;;  %v5056_v63 = vld [vmem:[#allocation2 + $0x3ec] sm:$0xf0] }
  0xf8   : > { %2670 = vmatpush.bf16.msrb.mxu3 %v4141_v59  ;;  %v4978_v59 = vld [vmem:[#allocation2 + $0x184] sm:$0xf] }
  0xf9   : > { %v4289_v37 = vor.u32 %v4978_v59, %v4286_v60  ;;  %v4446_v59 = vld [vmem:[#allocation2 + $0x2d0] sm:$0xf0]  ;;  %v4957_v60 = vld [vmem:[#allocation2 + $0xd4] sm:$0xf0] }
  0xfa   : > { %2684 = vmatpush.bf16.msrb.mxu1 %v4253_v55  ;;  %v4270_v55 = vld [vmem:[#allocation2 + $0x170] sm:$0xf0] }
  0xfb   : > { %2696 = vmatpush.bf16.msrb.mxu2 %v4397_v8  ;;  %v4273_v45 = vor.u32 %v4974_v9, %v4270_v55  ;;  %v4953_v9 = vld [vmem:[#allocation2 + $0xb4] sm:$0xf0] }
  0xfc   : > { %2671 = vmatpush.bf16.msrb.mxu3 %v4125_v5  ;;  %v4142_v5 = vld [vmem:[#allocation2 + $0x70] sm:$0xf0] }
  0xfd   : > { %v1642_v61 = vpop.f32.mrf.mxu0  ;;  %v4145_v10 = vor.u32 %v4942_v4, %v4142_v5  ;;  %v4180_v4 = vld [vmem:[#allocation2 + $0xa8] sm:$0xf]  ;;  %v5014_v5 = vld [vmem:[#allocation2 + $0x2a4] sm:$0xf] }
  0xfe   : > { %2685 = vmatpush.bf16.msrb.mxu1 %v4237_v7  ;;  %v1643_v36 = vadd.f32 %v1642_v61, %v1630_v26  ;;  %v4449_v61 = vor.u32 %v5018_v58, %v4446_v59  ;;  %v4324_v26 = vld [vmem:[#allocation2 + $0x1c8] sm:$0xf] }
  0xff   : > { %v4116_v59 = vld [vmem:[#allocation2 + $0x28] sm:$0xf] }
 0x100   : > { %2672 = vmatpush.bf16.msrb.mxu3 %v4109_v12  ;;  %v1655_v3 = vpop.f32.mrf.mxu1  ;;  %v5004_v12 = vld [vmem:[#allocation2 + $0x24c] sm:$0xf0] }
 0x101   : > { %v4381_v7 = vor.u32 %v5004_v12, %v4380_v11  ;;  %v1656_v52 = vadd.f32 %v1655_v3, %v1643_v36  ;;  %v4197_v3 = vor.u32 %v4957_v60, %v4196_v56  ;;  %v5052_v11 = vld [vmem:[#allocation2 + $0x3cc] sm:$0xf0]  ;;  %v4981_v56 = vld [vmem:[#allocation2 + $0x194] sm:$0xf0]  ;;  %v4998_v60 = vld [vmem:[#allocation2 + $0x224] sm:$0xf] }
 0x102   : > { %2686 = vmatpush.bf16.msrb.mxu1 %v4221_v33  ;;  %v4966_v33 = vld [vmem:[#allocation2 + $0x124] sm:$0xf] }
 0x103   : > { %2697 = vmatpush.bf16.msrb.mxu2 %v4381_v7 }
 0x104   : > { %2673 = vmatpush.bf16.msrb.mxu3 %v4093_v27  ;;  %v4934_v27 = vld [vmem:[#allocation2 + $0x24] sm:$0xf] }
 0x105   : > { %v1644_v20 = vpop.f32.mrf.mxu0  ;;  %v4113_v39 = vor.u32 %v4934_v27, %v4110_v28  ;;  %v4989_v27 = vld [vmem:[#allocation2 + $0x1d4] sm:$0xf0] }
 0x106   : > { %2731 = vmatpush.bf16.msra.mxu1 %v4337_v40  ;;  %v1668_v17 = vpop.f32.mrf.mxu3  ;;  %v4094_v40 = vld [vmem:[#allocation2 + $0x10] sm:$0xf0]  ;;  %v4341_v20 = vor.u32 %v4993_v14, %v4340_v13  ;;  %v4933_v13 = vld [vmem:[#allocation2 + $0x14] sm:$0xf0]  ;;  %v4994_v14 = vld [vmem:[#allocation2 + $0x204] sm:$0xf] }
 0x107   : > { %2674 = vmatmul.bf16.vlgmr.msrb.gmra.mxu3 %v6673_v51  ;;  %v1669_v54 = vadd.f32 %v1668_v17, %v1656_v52  ;;  %v4181_v17 = vor.u32 %v4953_v9, %v4180_v4  ;;  %v4941_v52 = vld [vmem:[#allocation2 + $0x54] sm:$0xf0]  ;;  %v4508_v4 = vld [vmem:[#allocation2 + $0x340] sm:$0xf] }
 0x108   : > { %2718 = vmatpush.bf16.msra.mxu3 %v4209_v32  ;;  %v1657_v29 = vpop.f32.mrf.mxu1  ;;  %v4365_v32 = vor.u32 %v5000_v24, %v4364_v23  ;;  %v5048_v23 = vld [vmem:[#allocation2 + $0x3ac] sm:$0xf0]  ;;  %v4133_v58 = vor.u32 %v4941_v52, %v4132_v48  ;;  %v4182_v52 = vld [vmem:[#allocation2 + $0xb8] sm:$0xf0] }
 0x10a   : > { %2732 = vmatpush.bf16.msra.mxu1 %v4321_v49  ;;  %2698 = vmatpush.bf16.msrb.mxu2 %v4365_v32  ;;  %v4962_v49 = vld [vmem:[#allocation2 + $0x104] sm:$0xf]  ;;  %v4148_v32 = vld [vmem:[#allocation2 + $0x68] sm:$0xf] }
 0x10b   : > { %v1681_v21 = vpop.f32.mrf.mxu2 }
 0x10c   : > { %2719 = vmatpush.bf16.msra.mxu3 %v4193_v15  ;;  %v4241_v15 = vor.u32 %v4966_v33, %v4238_v34  ;;  %v1682_v1 = vadd.f32 %v1681_v21, %v1669_v54  ;;  %v4414_v21 = vld [vmem:[#allocation2 + $0x290] sm:$0xf0]  ;;  %v5006_v33 = vld [vmem:[#allocation2 + $0x264] sm:$0xf]  ;;  %v5040_v54 = vld [vmem:[#allocation2 + $0x36c] sm:$0xf0] }
 0x10d   : > { %v4417_v28 = vor.u32 %v5010_v19, %v4414_v21  ;;  %v4398_v34 = vld [vmem:[#allocation2 + $0x270] sm:$0xf0]  ;;  %v5032_v19 = vld [vmem:[#allocation2 + $0x32c] sm:$0xf0]  ;;  %v4959_v21 = vld [vmem:[#allocation2 + $0xec] sm:$0xf] }
 0x10e   : > { %2733 = vmatpush.bf16.msra.mxu1 %v4305_v35  ;;  %v1670_v47 = vpop.f32.mrf.mxu3  ;;  %2699 = vmatpush.bf16.msrb.mxu2 %v4349_v6  ;;  %v4225_v35 = vor.u32 %v4962_v49, %v4222_v50  ;;  %v4401_v41 = vor.u32 %v5006_v33, %v4398_v34  ;;  %v4985_v6 = vld [vmem:[#allocation2 + $0x1b4] sm:$0xf0]  ;;  %v5002_v49 = vld [vmem:[#allocation2 + $0x244] sm:$0xf]  ;;  %v4382_v50 = vld [vmem:[#allocation2 + $0x250] sm:$0xf0] }
 0x110   : > { %2720 = vmatpush.bf16.msra.mxu3 %v4177_v53  ;;  %v4097_v53 = vor.u32 %v4930_v38, %v4094_v40  ;;  %v4945_v40 = vld [vmem:[#allocation2 + $0x74] sm:$0xf0] }
 0x111   : > { %v4149_v47 = vor.u32 %v4945_v40, %v4148_v32  ;;  %v4955_v32 = vld [vmem:[#allocation2 + $0xcc] sm:$0xf]  ;;  %v4198_v40 = vld [vmem:[#allocation2 + $0xd8] sm:$0xf0] }
 0x112   : > { %2734 = vmatpush.bf16.msra.mxu1 %v4289_v37  ;;  %2744 = vmatpush.bf16.msra.mxu2 %v4465_v57  ;;  %v4430_v37 = vld [vmem:[#allocation2 + $0x2b0] sm:$0xf0]  ;;  %v4201_v48 = vor.u32 %v4955_v32, %v4198_v40  ;;  %v4118_v40 = vld [vmem:[#allocation2 + $0x38] sm:$0xf0] }
 0x113   : > { %v1683_v25 = vpop.f32.mrf.mxu2  ;;  %v4433_v55 = vor.u32 %v5014_v5, %v4430_v37  ;;  %v5036_v5 = vld [vmem:[#allocation2 + $0x34c] sm:$0xf0]  ;;  %v4276_v37 = vld [vmem:[#allocation2 + $0x168] sm:$0xf] }
 0x114   : > { %2721 = vmatpush.bf16.msra.mxu3 %v4161_v62  ;;  %v4588_v62 = vld [vmem:[#allocation2 + $0x3e0] sm:$0xf]  ;;  %v4509_v9 = vor.u32 %v5036_v5, %v4508_v4  ;;  %v4987_v5 = vld [vmem:[#allocation2 + $0x1cc] sm:$0xf] }
 0x115   : > { %v4589_v0 = vor.u32 %v5056_v63, %v4588_v62  ;;  %v4524_v25 = vld [vmem:[#allocation2 + $0x360] sm:$0xf] }
 0x116   : > { %2735 = vmatpush.bf16.msra.mxu1 %v4273_v45  ;;  %2745 = vmatpush.bf16.msra.mxu2 %v4449_v61  ;;  %v1694_v8 = vpop.f32.mrf.mxu3  ;;  %v4164_v45 = vld [vmem:[#allocation2 + $0x88] sm:$0xf]  ;;  %v4366_v61 = vld [vmem:[#allocation2 + $0x230] sm:$0xf0] }
 0x117   : > { %2705 = vmatpush.bf16.msrb.mxu0 %v4589_v0  ;;  %v1695_v12 = vadd.f32 %v1694_v8, %v1682_v1  ;;  %v4165_v29 = vor.u32 %v4949_v18, %v4164_v45  ;;  %v4937_v1 = vld [vmem:[#allocation2 + $0x34] sm:$0xf0]  ;;  %v4492_v18 = vld [vmem:[#allocation2 + $0x320] sm:$0xf] }
 0x118   : > { %2722 = vmatpush.bf16.msra.mxu3 %v4145_v10  ;;  %v4572_v10 = vld [vmem:[#allocation2 + $0x3c0] sm:$0xf]  ;;  %v4977_v8 = vld [vmem:[#allocation2 + $0x174] sm:$0xf0] }
 0x119   : > { %v4573_v16 = vor.u32 %v5052_v11, %v4572_v10  ;;  %v1881_v7 = vmax.f32 %v1695_v12, 0.0  ;;  %v4100_v10 = vld [vmem:[#allocation2 + $0x8] sm:$0xf]  ;;  %v4117_v12 = vor.u32 %v4937_v1, %v4116_v59  ;;  %v4277_v45 = vor.u32 %v4977_v8, %v4276_v37  ;;  %v5046_v1 = vld [vmem:[#allocation2 + $0x3a4] sm:$0xf] }
 0x11a   : > { %2736 = vmatpush.bf16.msra.mxu1 %v4257_v31  ;;  %2746 = vmatpush.bf16.msra.mxu2 %v4433_v55 }
 0x11b   : > { %2706 = vmatpush.bf16.msrb.mxu0 %v4573_v16  ;;  %v6680_v24 = vpack.c.bf16 %v1881_v7, %v1881_v7  ;;  %v4350_v16 = vld [vmem:[#allocation2 + $0x210] sm:$0xf0]  ;;  %v4260_v7 = vld [vmem:[#allocation2 + $0x148] sm:$0xf] }
 0x11c   : > { %2723 = vmatpush.bf16.msra.mxu3 %v4129_v22  ;;  %v4556_v22 = vld [vmem:[#allocation2 + $0x3a0] sm:$0xf] }
 0x11d   : > { %v4557_v31 = vor.u32 %v5048_v23, %v4556_v22  ;;  %2687 = vmatmul.bf16.vlgmr.msrb.gmra.mxu1 %v6680_v24  ;;  %v6683_v38 = vpop.f32.mrf.mxu0  ;;  %v4214_v22 = vld [vmem:[#allocation2 + $0xf8] sm:$0xf0]  ;;  %v4493_v23 = vor.u32 %v5032_v19, %v4492_v18  ;;  %v4939_v18 = vld [vmem:[#allocation2 + $0x4c] sm:$0xf] }
 0x11e   : > { %2737 = vmatpush.bf16.msra.mxu1 %v4241_v15  ;;  %v1696_v36 = vpop.f32.mrf.mxu3  ;;  %2747 = vmatpush.bf16.msra.mxu2 %v4417_v28  ;;  %v4308_v15 = vld [vmem:[#allocation2 + $0x1a8] sm:$0xf]  ;;  %v4969_v28 = vld [vmem:[#allocation2 + $0x134] sm:$0xf0] }
 0x11f   : > { %2707 = vmatpush.bf16.msrb.mxu0 %v4557_v31  ;;  %v4309_v57 = vor.u32 %v4985_v6, %v4308_v15  ;;  %v4476_v36 = vld [vmem:[#allocation2 + $0x300] sm:$0xf]  ;;  %v526_v15 = vperm.slane %v6635_v2, 2 }
 0x120   : > { %2724 = vmatpush.bf16.msra.mxu3 %v4113_v39  ;;  %v4325_v39 = vor.u32 %v4989_v27, %v4324_v26  ;;  %v6685_v46 = vpop.f32.mrf.mxu1  ;;  %v4101_v26 = vor.u32 %v4933_v13, %v4100_v10  ;;  %v4244_v27 = vld [vmem:[#allocation2 + $0x128] sm:$0xf]  ;;  %v4943_v10 = vld [vmem:[#allocation2 + $0x6c] sm:$0xf]  ;;  %v5042_v13 = vld [vmem:[#allocation2 + $0x384] sm:$0xf] }
 0x122   : > { %2738 = vmatpush.bf16.msra.mxu1 %v4225_v35  ;;  %2748 = vmatpush.bf16.msra.mxu2 %v4401_v41  ;;  %v4525_v35 = vor.u32 %v5040_v54, %v4524_v25  ;;  %v4574_v25 = vld [vmem:[#allocation2 + $0x3d0] sm:$0xf0]  ;;  %v1708_v54 = vadd.f32 %v6685_v46, %v526_v15  ;;  %v4326_v46 = vld [vmem:[#allocation2 + $0x1d8] sm:$0xf0]  ;;  %v4975_v15 = vld [vmem:[#allocation2 + $0x16c] sm:$0xf] }
 0x123   : > { %2708 = vmatpush.bf16.msrb.mxu0 %v4541_v44  ;;  %v4593_v44 = vor.u32 %v5054_v42, %v4590_v43  ;;  %v4510_v42 = vld [vmem:[#allocation2 + $0x350] sm:$0xf0] }
 0x124   : > { %2725 = vmatpush.bf16.msra.mxu3 %v4097_v53  ;;  %v4385_v53 = vor.u32 %v5002_v49, %v4382_v50  ;;  %v4228_v49 = vld [vmem:[#allocation2 + $0x108] sm:$0xf]  ;;  %v4965_v50 = vld [vmem:[#allocation2 + $0x114] sm:$0xf0] }
 0x125   : > { %v1735_v63 = vpop.f32.mrf.mxu0 }
 0x126   : > { %2783 = vmatpush.bf16.msrb.mxu1 %v4341_v20  ;;  %2749 = vmatpush.bf16.msra.mxu2 %v4385_v53  ;;  %v4973_v20 = vld [vmem:[#allocation2 + $0x154] sm:$0xf0]  ;;  %v5050_v53 = vld [vmem:[#allocation2 + $0x3c4] sm:$0xf] }
 0x127   : > { %2726 = vmatmul.bf16.vlgmr.msra.gmra.mxu3 %v6673_v51  ;;  %2709 = vmatpush.bf16.msrb.mxu0 %v4525_v35  ;;  %v4261_v31 = vor.u32 %v4973_v20, %v4260_v7  ;;  %v4577_v35 = vor.u32 %v5050_v53, %v4574_v25  ;;  %v4310_v7 = vld [vmem:[#allocation2 + $0x1b8] sm:$0xf0]  ;;  %v5030_v25 = vld [vmem:[#allocation2 + $0x324] sm:$0xf] }
 0x128   : > { %2770 = vmatpush.bf16.msrb.mxu3 %v4213_v30  ;;  %v4292_v30 = vld [vmem:[#allocation2 + $0x188] sm:$0xf]  ;;  %v1709_v11 = vpop.f32.mrf.mxu1  ;;  %v4134_v20 = vld [vmem:[#allocation2 + $0x58] sm:$0xf0] }
 0x129   : > { %v4293_v0 = vor.u32 %v4981_v56, %v4292_v30  ;;  %v4991_v30 = vld [vmem:[#allocation2 + $0x1ec] sm:$0xf]  ;;  %v4342_v56 = vld [vmem:[#allocation2 + $0x1f8] sm:$0xf0]  ;;  %v4329_v11 = vor.u32 %v4987_v5, %v4326_v46  ;;  %v4478_v5 = vld [vmem:[#allocation2 + $0x310] sm:$0xf0] }
 0x12a   : > { %2784 = vmatpush.bf16.msrb.mxu1 %v4325_v39  ;;  %v6687_v62 = vpop.f32.mrf.mxu3  ;;  %v5028_v39 = vld [vmem:[#allocation2 + $0x30c] sm:$0xf0]  ;;  %v4345_v63 = vor.u32 %v4991_v30, %v4342_v56  ;;  %v4102_v53 = vld [vmem:[#allocation2 + $0x18] sm:$0xf0]  ;;  %v4971_v56 = vld [vmem:[#allocation2 + $0x14c] sm:$0xf] }
 0x12b   : > { %v6689_v55 = vpop.f32.mrf.mxu2  ;;  %2710 = vmatpush.bf16.msrb.mxu0 %v4509_v9  ;;  %v4477_v41 = vor.u32 %v5028_v39, %v4476_v36  ;;  %v1721_v4 = vadd.f32 %v6687_v62, %v1708_v54  ;;  %v4494_v54 = vld [vmem:[#allocation2 + $0x330] sm:$0xf0]  ;;  %v4967_v46 = vld [vmem:[#allocation2 + $0x12c] sm:$0xf] }
 0x12c   : > { %2771 = vmatpush.bf16.msrb.mxu3 %v4197_v3  ;;  %v4369_v3 = vor.u32 %v4998_v60, %v4366_v61  ;;  %v4947_v60 = vld [vmem:[#allocation2 + $0x8c] sm:$0xf] }
 0x12d   : > { %2739 = vmatmul.bf16.vlgmr.msra.gmra.mxu1 %v6680_v24  ;;  %v6692_v34 = vpop.f32.mrf.mxu0 }
 0x12e   : > { %2785 = vmatpush.bf16.msrb.mxu1 %v4309_v57  ;;  %2750 = vmatpush.bf16.msra.mxu2 %v4369_v3  ;;  %v4951_v57 = vld [vmem:[#allocation2 + $0xac] sm:$0xf]  ;;  %v4558_v3 = vld [vmem:[#allocation2 + $0x3b0] sm:$0xf0] }
 0x12f   : > { %2711 = vmatpush.bf16.msrb.mxu0 %v4493_v23  ;;  %v4185_v59 = vor.u32 %v4951_v57, %v4182_v52  ;;  %v4561_v37 = vor.u32 %v5046_v1, %v4558_v3  ;;  %v4931_v57 = vld [vmem:[#allocation2 + $0xc] sm:$0xf] }
 0x130   : > { %2772 = vmatpush.bf16.msrb.mxu3 %v4181_v17  ;;  %v4353_v17 = vor.u32 %v4994_v14, %v4350_v16  ;;  %v4542_v14 = vld [vmem:[#allocation2 + $0x390] sm:$0xf0]  ;;  %v1734_v16 = vadd.f32 %v6683_v38, %v1721_v4  ;;  %v5026_v4 = vld [vmem:[#allocation2 + $0x304] sm:$0xf] }
 0x131   : > { %v4545_v62 = vor.u32 %v5042_v13, %v4542_v14  ;;  %v4963_v14 = vld [vmem:[#allocation2 + $0x10c] sm:$0xf] }
 0x132   : > { %2786 = vmatpush.bf16.msrb.mxu1 %v4293_v0  ;;  %v1722_v33 = vpop.f32.mrf.mxu3  ;;  %2751 = vmatpush.bf16.msra.mxu2 %v4353_v17  ;;  %v4166_v0 = vld [vmem:[#allocation2 + $0x98] sm:$0xf0]  ;;  %v1747_v23 = vadd.f32 %v6689_v55, %v1734_v16 }
 0x133   : > { %v1748_v6 = vpop.f32.mrf.mxu2  ;;  %2712 = vmatpush.bf16.msrb.mxu0 %v4477_v41  ;;  %v4169_v9 = vor.u32 %v4947_v60, %v4166_v0  ;;  %v4935_v33 = vld [vmem:[#allocation2 + $0x2c] sm:$0xf]  ;;  %v5034_v41 = vld [vmem:[#allocation2 + $0x344] sm:$0xf]  ;;  %v4278_v55 = vld [vmem:[#allocation2 + $0x178] sm:$0xf0] }
 0x134   : > { %2773 = vmatpush.bf16.msrb.mxu3 %v4165_v29  ;;  %v4217_v29 = vor.u32 %v4959_v21, %v4214_v22  ;;  %v5038_v21 = vld [vmem:[#allocation2 + $0x364] sm:$0xf]  ;;  %v4526_v22 = vld [vmem:[#allocation2 + $0x370] sm:$0xf0]  ;;  %v4281_v52 = vor.u32 %v4975_v15, %v4278_v55  ;;  %v5021_v0 = vld [vmem:[#allocation2 + $0x2d4] sm:$0xf0] }
 0x135   : > { %v1787_v61 = vpop.f32.mrf.mxu0  ;;  %v4529_v38 = vor.u32 %v5038_v21, %v4526_v22  ;;  %v4230_v16 = vld [vmem:[#allocation2 + $0x118] sm:$0xf0]  ;;  %v5009_v21 = vld [vmem:[#allocation2 + $0x274] sm:$0xf0]  ;;  %v5023_v55 = vld [vmem:[#allocation2 + $0x2ec] sm:$0xf] }
 0x136   : > { %2787 = vmatpush.bf16.msrb.mxu1 %v4277_v45  ;;  %v4983_v45 = vld [vmem:[#allocation2 + $0x1ac] sm:$0xf] }
 0x137   : > { %2757 = vmatpush.bf16.msra.mxu0 %v4593_v44  ;;  %v4313_v19 = vor.u32 %v4983_v45, %v4310_v7  ;;  %v4513_v44 = vor.u32 %v5034_v41, %v4510_v42  ;;  %v4420_v7 = vld [vmem:[#allocation2 + $0x288] sm:$0xf] }
 0x138   : > { %2774 = vmatpush.bf16.msrb.mxu3 %v4149_v47  ;;  %v4245_v47 = vor.u32 %v4969_v28, %v4244_v27  ;;  %v4294_v27 = vld [vmem:[#allocation2 + $0x198] sm:$0xf0] }
 0x13a   : > { %2788 = vmatpush.bf16.msrb.mxu1 %v4261_v31 }
 0x13b   : > { %2758 = vmatpush.bf16.msra.mxu0 %v4577_v35  ;;  %v4262_v35 = vld [vmem:[#allocation2 + $0x158] sm:$0xf0] }
 0x13c   : > { %2775 = vmatpush.bf16.msrb.mxu3 %v4133_v58  ;;  %v4229_v58 = vor.u32 %v4965_v50, %v4228_v49  ;;  %v4468_v49 = vld [vmem:[#allocation2 + $0x2e8] sm:$0xf]  ;;  %v5025_v50 = vld [vmem:[#allocation2 + $0x2f4] sm:$0xf0]  ;;  %v4265_v1 = vor.u32 %v4971_v56, %v4262_v35 }
 0x13d   : > { %v4469_v60 = vor.u32 %v5025_v50, %v4468_v49  ;;  %v5019_v50 = vld [vmem:[#allocation2 + $0x2cc] sm:$0xf] }
 0x13e   : > { %2789 = vmatpush.bf16.msrb.mxu1 %v4245_v47  ;;  %v1759_v8 = vpop.f32.mrf.mxu1 }
 0x13f   : > { %2759 = vmatpush.bf16.msra.mxu0 %v4561_v37  ;;  %v1760_v31 = vadd.f32 %v1759_v8, %v1747_v23  ;;  %v4246_v37 = vld [vmem:[#allocation2 + $0x138] sm:$0xf0] }
 0x140   : > { %2776 = vmatpush.bf16.msrb.mxu3 %v4117_v12  ;;  %v4150_v12 = vld [vmem:[#allocation2 + $0x78] sm:$0xf0]  ;;  %v4249_v13 = vor.u32 %v4967_v46, %v4246_v37  ;;  %v4564_v37 = vld [vmem:[#allocation2 + $0x3a8] sm:$0xf] }
 0x141   : > { %v4153_v17 = vor.u32 %v4943_v10, %v4150_v12  ;;  %v5017_v12 = vld [vmem:[#allocation2 + $0x2b4] sm:$0xf0]  ;;  %v4422_v46 = vld [vmem:[#allocation2 + $0x298] sm:$0xf0] }
 0x142   : > { %2790 = vmatpush.bf16.msrb.mxu1 %v4229_v58  ;;  %v6701_v28 = vpop.f32.mrf.mxu0 }
 0x143   : > { %2760 = vmatpush.bf16.msra.mxu0 %v4545_v62  ;;  %v5013_v62 = vld [vmem:[#allocation2 + $0x294] sm:$0xf0] }
 0x144   : > { %2777 = vmatpush.bf16.msrb.mxu3 %v4101_v26  ;;  %v4979_v26 = vld [vmem:[#allocation2 + $0x18c] sm:$0xf] }
 0x145   : > { %2791 = vmatmul.bf16.vlgmr.msrb.gmra.mxu1 %v6680_v24  ;;  %v4297_v39 = vor.u32 %v4979_v26, %v4294_v27  ;;  %v4388_v27 = vld [vmem:[#allocation2 + $0x248] sm:$0xf] }
 0x146   : > { %2835 = vmatpush.bf16.msra.mxu1 %v4345_v63  ;;  %v1761_v32 = vpop.f32.mrf.mxu1  ;;  %v4452_v63 = vld [vmem:[#allocation2 + $0x2c8] sm:$0xf] }
 0x147   : > { %2778 = vmatmul.bf16.vlgmr.msrb.gmra.mxu3 %v6673_v51  ;;  %2761 = vmatpush.bf16.msra.mxu0 %v4529_v38  ;;  %v4453_v10 = vor.u32 %v5021_v0, %v4452_v63  ;;  %v5001_v32 = vld [vmem:[#allocation2 + $0x234] sm:$0xf0]  ;;  %v4580_v63 = vld [vmem:[#allocation2 + $0x3c8] sm:$0xf] }
 0x148   : > { %2822 = vmatpush.bf16.msra.mxu3 %v4217_v29  ;;  %v4137_v29 = vor.u32 %v4939_v18, %v4134_v20  ;;  %v4233_v18 = vor.u32 %v4963_v14, %v4230_v16  ;;  %v4404_v20 = vld [vmem:[#allocation2 + $0x268] sm:$0xf]  ;;  %v5053_v0 = vld [vmem:[#allocation2 + $0x3d4] sm:$0xf0] }
 0x149   : > { %v4405_v26 = vor.u32 %v5009_v21, %v4404_v20  ;;  %v5045_v14 = vld [vmem:[#allocation2 + $0x394] sm:$0xf0]  ;;  %v4999_v21 = vld [vmem:[#allocation2 + $0x22c] sm:$0xf] }
 0x14a   : > { %2836 = vmatpush.bf16.msra.mxu1 %v4329_v11  ;;  %v1772_v36 = vpop.f32.mrf.mxu3  ;;  %v1813_v58 = vpop.f32.mrf.mxu0  ;;  %v4436_v11 = vld [vmem:[#allocation2 + $0x2a8] sm:$0xf] }
 0x14b   : > { %v1773_v43 = vadd.f32 %v1772_v36, %v1760_v31  ;;  %v1798_v6 = vpop.f32.mrf.mxu2  ;;  %2762 = vmatpush.bf16.msra.mxu0 %v4513_v44  ;;  %v4437_v45 = vor.u32 %v5017_v12, %v4436_v11  ;;  %v5007_v11 = vld [vmem:[#allocation2 + $0x26c] sm:$0xf]  ;;  %v4406_v12 = vld [vmem:[#allocation2 + $0x278] sm:$0xf0] }
 0x14c   : > { %2823 = vmatpush.bf16.msra.mxu3 %v4201_v48  ;;  %v4121_v48 = vor.u32 %v4935_v33, %v4118_v40  ;;  %v4409_v16 = vor.u32 %v5007_v11, %v4406_v12 }
 0x14d   : > { %v1786_v47 = vadd.f32 %v6692_v34, %v1773_v43  ;;  %v4105_v34 = vor.u32 %v4931_v57, %v4102_v53  ;;  %v4356_v43 = vld [vmem:[#allocation2 + $0x208] sm:$0xf]  ;;  %v4454_v57 = vld [vmem:[#allocation2 + $0x2d8] sm:$0xf0] }
 0x14e   : > { %2837 = vmatpush.bf16.msra.mxu1 %v4313_v19  ;;  %v4421_v19 = vor.u32 %v5013_v62, %v4420_v7  ;;  %v4457_v35 = vor.u32 %v5019_v50, %v4454_v57  ;;  %v5003_v7 = vld [vmem:[#allocation2 + $0x24c] sm:$0xf]  ;;  %v4390_v62 = vld [vmem:[#allocation2 + $0x258] sm:$0xf0]  ;;  %v6722_v57 = vld [vmem:[%s6780_s4] sm:$0xf] }
 0x14f   : > { %v1882_v30 = vmax.f32 %v1786_v47, 0.0  ;;  %v4550_v50 = vld [vmem:[#allocation2 + $0x398] sm:$0xf0] }
 0x150   : > { %2824 = vmatpush.bf16.msra.mxu3 %v4185_v59  ;;  %v4497_v59 = vor.u32 %v5030_v25, %v4494_v54  ;;  %v4596_v25 = vld [vmem:[#allocation2 + $0x3e8] sm:$0xf]  ;;  %v5057_v54 = vld [vmem:[#allocation2 + $0x3f4] sm:$0xf0] }
 0x151   : > { %v6704_v61 = vpack.c.bf16 %v1882_v30, %v1882_v30  ;;  %v4597_v58 = vor.u32 %v5057_v54, %v4596_v25  ;;  %v4534_v25 = vld [vmem:[#allocation2 + $0x378] sm:$0xf0] }
 0x152   : > { %2838 = vmatpush.bf16.msra.mxu1 %v4297_v39  ;;  %v1774_v3 = vpop.f32.mrf.mxu3  ;;  %2763 = vmatpush.bf16.msra.mxu0 %v4497_v59  ;;  %v5015_v59 = vld [vmem:[#allocation2 + $0x2ac] sm:$0xf] }
 0x153   : > { %2700 = vmatmul.bf16.vlgmr.msrb.gmra.mxu2 %v6704_v61  ;;  %v1800_v8 = vpop.f32.mrf.mxu2 }
 0x154   : > { %2825 = vmatpush.bf16.msra.mxu3 %v4169_v9  ;;  %v4481_v9 = vor.u32 %v5026_v4, %v4478_v5  ;;  %2796 = vmatpush.bf16.msrb.mxu2 %v4469_v60  ;;  %v4438_v60 = vld [vmem:[#allocation2 + $0x2b8] sm:$0xf0]  ;;  %v4581_v4 = vor.u32 %v5053_v0, %v4580_v63  ;;  %v5011_v5 = vld [vmem:[#allocation2 + $0x28c] sm:$0xf]  ;;  %v5049_v8 = vld [vmem:[#allocation2 + $0x3b4] sm:$0xf0] }
 0x155   : > { %v5031_v0 = vld [vmem:[#allocation2 + $0x32c] sm:$0xf] }
 0x156   : > { %2839 = vmatpush.bf16.msra.mxu1 %v4281_v52  ;;  %2764 = vmatpush.bf16.msra.mxu0 %v4481_v9  ;;  %v4425_v9 = vor.u32 %v5011_v5, %v4422_v46  ;;  %v4486_v5 = vld [vmem:[#allocation2 + $0x318] sm:$0xf0] }
 0x158   : > { %2826 = vmatpush.bf16.msra.mxu3 %v4153_v17  ;;  %2797 = vmatpush.bf16.msrb.mxu2 %v4453_v10  ;;  %v527_v17 = vperm.slane %v6635_v2, 3  ;;  %v4565_v10 = vor.u32 %v5049_v8, %v4564_v37 }
 0x15a   : > { %2840 = vmatpush.bf16.msra.mxu1 %v4265_v1  ;;  %v1799_v22 = vadd.f32 %v1798_v6, %v527_v17  ;;  %v4470_v6 = vld [vmem:[#allocation2 + $0x2f8] sm:$0xf0]  ;;  %v4441_v1 = vor.u32 %v5015_v59, %v4438_v60  ;;  %v4532_v17 = vld [vmem:[#allocation2 + $0x368] sm:$0xf] }
 0x15c   : > { %2827 = vmatpush.bf16.msra.mxu3 %v4137_v29  ;;  %2798 = vmatpush.bf16.msrb.mxu2 %v4437_v45  ;;  %v1812_v38 = vadd.f32 %v6701_v28, %v1799_v22  ;;  %v4372_v29 = vld [vmem:[#allocation2 + $0x228] sm:$0xf]  ;;  %v4374_v22 = vld [vmem:[#allocation2 + $0x238] sm:$0xf0] }
 0x15d   : > { %v4373_v42 = vor.u32 %v5001_v32, %v4372_v29  ;;  %v4500_v29 = vld [vmem:[#allocation2 + $0x328] sm:$0xf]  ;;  %v5033_v32 = vld [vmem:[#allocation2 + $0x334] sm:$0xf0] }
 0x15e   : > { %2841 = vmatpush.bf16.msra.mxu1 %v4249_v13  ;;  %v1824_v23 = vpop.f32.mrf.mxu1  ;;  %v4548_v13 = vld [vmem:[#allocation2 + $0x388] sm:$0xf] }
 0x15f   : > { %v1825_v33 = vadd.f32 %v1824_v23, %v1812_v38  ;;  %v4549_v45 = vor.u32 %v5045_v14, %v4548_v13  ;;  %v4516_v23 = vld [vmem:[#allocation2 + $0x348] sm:$0xf]  ;;  %v5065_v13 = vld [vmem:[#allocation5 + $0x38] sm:$0xff] }
 0x160   : > { %2828 = vmatpush.bf16.msra.mxu3 %v4121_v48  ;;  %2799 = vmatpush.bf16.msrb.mxu2 %v4421_v19  ;;  %v4473_v48 = vor.u32 %v5023_v55, %v4470_v6  ;;  %v4393_v19 = vor.u32 %v5003_v7, %v4390_v62  ;;  %v5051_v55 = vld [vmem:[#allocation2 + $0x3cc] sm:$0xf]  ;;  %v4582_v6 = vld [vmem:[#allocation2 + $0x3d8] sm:$0xf0] }
 0x162   : > { %2842 = vmatpush.bf16.msra.mxu1 %v4233_v18  ;;  %v1863_v2 = vpop.f32.mrf.mxu0  ;;  %v5041_v18 = vld [vmem:[#allocation2 + $0x374] sm:$0xf0] }
 0x163   : > { %2752 = vmatmul.bf16.vlgmr.msra.gmra.mxu2 %v6704_v61  ;;  %v4533_v20 = vor.u32 %v5041_v18, %v4532_v17  ;;  %v5063_v17 = vld [vmem:[#allocation5 + $0x28] sm:$0xff] }
 0x164   : > { %2829 = vmatpush.bf16.msra.mxu3 %v4105_v34  ;;  %2800 = vmatpush.bf16.msrb.mxu2 %v4405_v26  ;;  %v5037_v26 = vld [vmem:[#allocation2 + $0x354] sm:$0xf0] }
 0x165   : > { %2843 = vmatmul.bf16.vlgmr.msra.gmra.mxu1 %v6680_v24  ;;  %v4997_v24 = vld [vmem:[#allocation2 + $0x214] sm:$0xf0]  ;;  %v4517_v38 = vor.u32 %v5037_v26, %v4516_v23  ;;  %v5060_v26 = vld [vmem:[#allocation5 + $0x10] sm:$0xff] }
 0x166   : > { %v1826_v36 = vpop.f32.mrf.mxu1  ;;  %v4357_v47 = vor.u32 %v4997_v24, %v4356_v43  ;;  %v4598_v43 = vld [vmem:[#allocation2 + $0x3f8] sm:$0xf0] }
 0x167   : > { %2830 = vmatmul.bf16.vlgmr.msra.gmra.mxu3 %v6673_v51  ;;  %v5005_v51 = vld [vmem:[#allocation2 + $0x254] sm:$0xf0]  ;;  %v4501_v36 = vor.u32 %v5033_v32, %v4500_v29  ;;  %v2021_v32 = vperm.slane %v6722_v57, 3 }
 0x168   : > { %v4389_v31 = vor.u32 %v5005_v51, %v4388_v27  ;;  %v4377_v51 = vor.u32 %v4999_v21, %v4374_v22  ;;  %3142 = vmatpush.bf16.msrb.mxu3 %v5065_v13  ;;  %v5061_v22 = vld [vmem:[#allocation5 + $0x18] sm:$0xff]  ;;  %v5083_v13 = vld [vmem:[#allocation5 + $0xc8] sm:$0xff] }
 0x169   : > { %v5073_v23 = vld [vmem:[#allocation5 + $0x78] sm:$0xff] }
 0x16a   : > { %v1837_v39 = vpop.f32.mrf.mxu3  ;;  %2801 = vmatpush.bf16.msrb.mxu2 %v4389_v31  ;;  %v1865_v28 = vpop.f32.mrf.mxu0  ;;  %v4358_v31 = vld [vmem:[#allocation2 + $0x218] sm:$0xf0]  ;;  %3155 = vmatpush.bf16.msrb.mxu1 %v5073_v23 }
 0x16b   : > { %v1838_v40 = vadd.f32 %v1837_v39, %v1825_v33  ;;  %v1850_v41 = vpop.f32.mrf.mxu2  ;;  %v4484_v39 = vld [vmem:[#allocation2 + $0x308] sm:$0xf]  ;;  %v4585_v28 = vor.u32 %v5051_v55, %v4582_v6 }
 0x16c   : > { %v5067_v55 = vld [vmem:[#allocation5 + $0x48] sm:$0xff] }
 0x16d   : > { %v1851_v15 = vadd.f32 %v1850_v41, %v1838_v40  ;;  %v5029_v40 = vld [vmem:[#allocation2 + $0x314] sm:$0xf0]  ;;  %v5079_v6 = vld [vmem:[#allocation5 + $0xa8] sm:$0xff] }
 0x16e   : > { %2802 = vmatpush.bf16.msrb.mxu2 %v4373_v42  ;;  %v1876_v49 = vpop.f32.mrf.mxu1  ;;  %v5055_v42 = vld [vmem:[#allocation2 + $0x3ec] sm:$0xf]  ;;  %v4485_v24 = vor.u32 %v5029_v40, %v4484_v39 }
 0x16f   : > { %v1864_v44 = vadd.f32 %v1863_v2, %v1851_v15  ;;  %v4995_v2 = vld [vmem:[#allocation2 + $0x20c] sm:$0xf]  ;;  %v4601_v15 = vor.u32 %v5055_v42, %v4598_v43  ;;  %v5080_v42 = vld [vmem:[#allocation5 + $0xb0] sm:$0xff] }
 0x170   : > { %v4361_v33 = vor.u32 %v4995_v2, %v4358_v31  ;;  %v5058_v2 = vld [vmem:[#allocation5] sm:$0xff] }
 0x171   : > { %v1877_v52 = vadd.f32 %v1876_v49, %v1864_v44  ;;  %v5047_v44 = vld [vmem:[#allocation2 + $0x3ac] sm:$0xf]  ;;  %v5070_v31 = vld [vmem:[#allocation5 + $0x60] sm:$0xff] }
 0x172   : > { %v1839_v53 = vpop.f32.mrf.mxu3  ;;  %2803 = vmatpush.bf16.msrb.mxu2 %v4357_v47  ;;  %v4566_v47 = vld [vmem:[#allocation2 + $0x3b8] sm:$0xf0]  ;;  %v5043_v49 = vld [vmem:[#allocation2 + $0x38c] sm:$0xf] }
 0x173   : > { %v1852_v30 = vpop.f32.mrf.mxu2  ;;  %v1883_v56 = vmax.f32 %v1877_v52, 0.0  ;;  %v2018_v52 = vperm.slane %v6722_v57, 0  ;;  %v5039_v53 = vld [vmem:[#allocation2 + $0x36c] sm:$0xf] }
 0x174   : > { %v4537_v54 = vor.u32 %v5039_v53, %v4534_v25  ;;  %v5075_v53 = vld [vmem:[#allocation5 + $0x88] sm:$0xff] }
 0x175   : > { %v6712_v34 = vpack.c.bf16 %v1883_v56, %v1883_v56  ;;  %2804 = vmatmul.bf16.vlgmr.msrb.gmra.mxu2 %v6704_v61  ;;  %v5035_v56 = vld [vmem:[#allocation2 + $0x34c] sm:$0xf] }
 0x176   : > { %2848 = vmatpush.bf16.msra.mxu2 %v4473_v48  ;;  %v1878_v3 = vpop.f32.mrf.mxu1  ;;  %v4569_v48 = vor.u32 %v5047_v44, %v4566_v47  ;;  %v5066_v44 = vld [vmem:[#allocation5 + $0x40] sm:$0xff] }
 0x177   : > { %2713 = vmatmul.bf16.vlgmr.msrb.gmra.mxu0 %v6712_v34  ;;  %v5078_v47 = vld [vmem:[#allocation5 + $0xa0] sm:$0xff] }
 0x178   : > { %2809 = vmatpush.bf16.msrb.mxu0 %v4597_v58 }
 0x17a   : > { %2849 = vmatpush.bf16.msra.mxu2 %v4457_v35  ;;  %v4518_v35 = vld [vmem:[#allocation2 + $0x358] sm:$0xf0] }
 0x17b   : > { %v4521_v63 = vor.u32 %v5035_v56, %v4518_v35  ;;  %v5074_v56 = vld [vmem:[#allocation5 + $0x80] sm:$0xff]  ;;  %v5089_v35 = vld [vmem:[#allocation5 + $0xf8] sm:$0xff] }
 0x17c   : > { %2810 = vmatpush.bf16.msrb.mxu0 %v4581_v4  ;;  %v5027_v4 = vld [vmem:[#allocation2 + $0x30c] sm:$0xf] }
 0x17d   : > { %v4489_v8 = vor.u32 %v5027_v4, %v4486_v5  ;;  %v5086_v4 = vld [vmem:[#allocation5 + $0xe0] sm:$0xff] }
 0x17e   : > { %2850 = vmatpush.bf16.msra.mxu2 %v4441_v1  ;;  %v4502_v1 = vld [vmem:[#allocation2 + $0x338] sm:$0xf0] }
 0x17f   : > { %v4505_v3 = vor.u32 %v5031_v0, %v4502_v1  ;;  %v5087_v1 = vld [vmem:[#allocation5 + $0xe8] sm:$0xff] }
 0x180   : > { %2811 = vmatpush.bf16.msrb.mxu0 %v4565_v10 }
 0x182   : > { %2851 = vmatpush.bf16.msra.mxu2 %v4425_v9  ;;  %v2019_v9 = vperm.slane %v6722_v57, 1 }
 0x184   : > { %2812 = vmatpush.bf16.msrb.mxu0 %v4549_v45  ;;  %v5064_v45 = vld [vmem:[#allocation5 + $0x30] sm:$0xff] }
 0x185   : > { %3143 = vmatpush.bf16.msrb.mxu3 %v5064_v45 }
 0x186   : > { %2852 = vmatpush.bf16.msra.mxu2 %v4409_v16  ;;  %v2020_v16 = vperm.slane %v6722_v57, 2  ;;  %v5076_v57 = vld [vmem:[#allocation5 + $0x90] sm:$0xff] }
 0x187   : > { %2765 = vmatmul.bf16.vlgmr.msra.gmra.mxu0 %v6712_v34 }
 0x188   : > { %2813 = vmatpush.bf16.msrb.mxu0 %v4533_v20  ;;  %v5062_v20 = vld [vmem:[#allocation5 + $0x20] sm:$0xff] }
 0x189   : > { %3144 = vmatpush.bf16.msrb.mxu3 %v5063_v17 }
 0x18a   : > { %v2675_v27 = vpop.f32.mrf.mxu3  ;;  %2853 = vmatpush.bf16.msra.mxu2 %v4393_v19 }
 0x18b   : > { %v2676_v30 = vadd.f32 %v2675_v27, %v2018_v52  ;;  %v5072_v27 = vld [vmem:[#allocation5 + $0x70] sm:$0xff] }
 0x18c   : > { %2814 = vmatpush.bf16.msrb.mxu0 %v4517_v38  ;;  %3156 = vmatpush.bf16.msrb.mxu1 %v5072_v27  ;;  %v5071_v38 = vld [vmem:[#allocation5 + $0x68] sm:$0xff] }
 0x18d   : > { %3145 = vmatpush.bf16.msrb.mxu3 %v5062_v20 }
 0x18e   : > { %2854 = vmatpush.bf16.msra.mxu2 %v4377_v51  ;;  %v5059_v51 = vld [vmem:[#allocation5 + $0x8] sm:$0xff] }
 0x190   : > { %2815 = vmatpush.bf16.msrb.mxu0 %v4501_v36  ;;  %3157 = vmatpush.bf16.msrb.mxu1 %v5071_v38  ;;  %v5081_v36 = vld [vmem:[#allocation5 + $0xb8] sm:$0xff] }
 0x191   : > { %3146 = vmatpush.bf16.msrb.mxu3 %v5061_v22 }
 0x192   : > { %v2677_v41 = vpop.f32.mrf.mxu3  ;;  %2855 = vmatpush.bf16.msra.mxu2 %v4361_v33  ;;  %v5069_v33 = vld [vmem:[#allocation5 + $0x58] sm:$0xff] }
 0x193   : > { %v5068_v41 = vld [vmem:[#allocation5 + $0x50] sm:$0xff] }
 0x194   : > { %2816 = vmatpush.bf16.msrb.mxu0 %v4485_v24  ;;  %3158 = vmatpush.bf16.msrb.mxu1 %v5070_v31 }
 0x195   : > { %2856 = vmatmul.bf16.vlgmr.msra.gmra.mxu2 %v6704_v61  ;;  %v4553_v61 = vor.u32 %v5043_v49, %v4550_v50  ;;  %3147 = vmatpush.bf16.msrb.mxu3 %v5060_v26  ;;  %v5077_v50 = vld [vmem:[#allocation5 + $0x98] sm:$0xff] }
 0x196   : > { %3168 = vmatpush.bf16.msrb.mxu2 %v5081_v36 }
 0x197   : > { %2817 = vmatmul.bf16.vlgmr.msrb.gmra.mxu0 %v6712_v34 }
 0x198   : > { %2861 = vmatpush.bf16.msra.mxu0 %v4601_v15  ;;  %3159 = vmatpush.bf16.msrb.mxu1 %v5069_v33 }
 0x199   : > { %3148 = vmatpush.bf16.msrb.mxu3 %v5059_v51 }
 0x19a   : > { %v2688_v58 = vpop.f32.mrf.mxu1  ;;  %3169 = vmatpush.bf16.msrb.mxu2 %v5080_v42 }
 0x19b   : > { %v6725_v60 = vadd.f32 %v2688_v58, %v2676_v30 }
 0x19c   : > { %2862 = vmatpush.bf16.msra.mxu0 %v4585_v28  ;;  %3160 = vmatpush.bf16.msrb.mxu1 %v5068_v41 }
 0x19d   : > { %3149 = vmatpush.bf16.msrb.mxu3 %v5058_v2 }
 0x19e   : > { %3170 = vmatpush.bf16.msrb.mxu2 %v5079_v6 }
 0x1a0   : > { %2863 = vmatpush.bf16.msra.mxu0 %v4569_v48  ;;  %3161 = vmatpush.bf16.msrb.mxu1 %v5067_v55 }
 0x1a2   : > { %v2690_v46 = vpop.f32.mrf.mxu1  ;;  %3171 = vmatpush.bf16.msrb.mxu2 %v5078_v47 }
 0x1a4   : > { %2864 = vmatpush.bf16.msra.mxu0 %v4553_v61  ;;  %3162 = vmatpush.bf16.msrb.mxu1 %v5066_v44 }
 0x1a6   : > { %3172 = vmatpush.bf16.msrb.mxu2 %v5077_v50 }
 0x1a8   : > { %2865 = vmatpush.bf16.msra.mxu0 %v4537_v54 }
 0x1aa   : > { %v2727_v59 = vpop.f32.mrf.mxu3  ;;  %v2740_v11 = vpop.f32.mrf.mxu1  ;;  %3173 = vmatpush.bf16.msrb.mxu2 %v5076_v57 }
 0x1ab   : > { %v2728_v10 = vadd.f32 %v2727_v59, %v2019_v9 }
 0x1ac   : > { %2866 = vmatpush.bf16.msra.mxu0 %v4521_v63  ;;  %v5088_v63 = vld [vmem:[#allocation5 + $0xf0] sm:$0xff] }
 0x1ad   : > { %v6728_v12 = vadd.f32 %v2740_v11, %v2728_v10  ;;  %v5084_v10 = vld [vmem:[#allocation5 + $0xd0] sm:$0xff] }
 0x1ae   : > { %3174 = vmatpush.bf16.msrb.mxu2 %v5075_v53 }
 0x1b0   : > { %2867 = vmatpush.bf16.msra.mxu0 %v4505_v3 }
 0x1b2   : > { %v2729_v37 = vpop.f32.mrf.mxu3  ;;  %v2742_v14 = vpop.f32.mrf.mxu1  ;;  %3175 = vmatpush.bf16.msrb.mxu2 %v5074_v56 }
 0x1b3   : > { %v5085_v37 = vld [vmem:[#allocation5 + $0xd8] sm:$0xff] }
 0x1b4   : > { %2868 = vmatpush.bf16.msra.mxu0 %v4489_v8 }
 0x1b7   : > { %2869 = vmatmul.bf16.vlgmr.msra.gmra.mxu0 %v6712_v34 }
 0x1b8   : > { %3181 = vmatpush.bf16.msrb.mxu0 %v5089_v35 }
 0x1bc   : > { %3182 = vmatpush.bf16.msrb.mxu0 %v5088_v63 }
 0x1c0   : > { %3183 = vmatpush.bf16.msrb.mxu0 %v5087_v1 }
 0x1c2   : > { %v2792_v18 = vpop.f32.mrf.mxu1 }
 0x1c4   : > { %3184 = vmatpush.bf16.msrb.mxu0 %v5086_v4 }
 0x1c8   : > { %3185 = vmatpush.bf16.msrb.mxu0 %v5085_v37 }
 0x1ca   : > { %v2779_v7 = vpop.f32.mrf.mxu3  ;;  %v2794_v34 = vpop.f32.mrf.mxu1 }
 0x1cb   : > { %v2780_v62 = vadd.f32 %v2779_v7, %v2020_v16  ;;  %v5082_v16 = vld [vmem:[#allocation5 + $0xc0] sm:$0xff] }
 0x1cc   : > { %3186 = vmatpush.bf16.msrb.mxu0 %v5084_v10 }
 0x1cd   : > { %v6732_v19 = vadd.f32 %v2792_v18, %v2780_v62 }
 0x1d0   : > { %3187 = vmatpush.bf16.msrb.mxu0 %v5083_v13 }
 0x1d2   : > { %v2781_v21 = vpop.f32.mrf.mxu3 }
 0x1d4   : > { %3188 = vmatpush.bf16.msrb.mxu0 %v5082_v16 }
 0x1d6   : > { %v2701_v29 = vpop.f32.mrf.mxu2 }
 0x1d7   : > { %v2702_v52 = vadd.f32 %v2701_v29, %v6725_v60 }
 0x1de   : > { %v2703_v24 = vpop.f32.mrf.mxu2 }
 0x1e2   : > { %v2844_v43 = vpop.f32.mrf.mxu1 }
 0x1e6   : > { %v2753_v49 = vpop.f32.mrf.mxu2 }
 0x1e7   : > { %v2754_v60 = vadd.f32 %v2753_v49, %v6728_v12 }
 0x1ea   : > { %v2831_v39 = vpop.f32.mrf.mxu3  ;;  %v2846_v48 = vpop.f32.mrf.mxu1 }
 0x1eb   : > { %v2832_v40 = vadd.f32 %v2831_v39, %v2021_v32  ;;  %v5155_v32 = vld [vmem:[%s6782_s6] ss:$0 sm:$0xff] }
 0x1ed   : > { %v6735_v15 = vadd.f32 %v2844_v43, %v2832_v40 }
 0x1ee   : > { %v2755_v61 = vpop.f32.mrf.mxu2 }
 0x1f2   : > { %v2833_v28 = vpop.f32.mrf.mxu3 }
 0x1f4   : > { %v2714_v25 = vpop.f32.mrf.mxu0 }
 0x1f5   : > { %v2715_v54 = vadd.f32 %v2714_v25, %v2702_v52 }
 0x1f7   : > { %v2874_v30 = vmax.f32 %v2715_v54, 0.0 }
 0x1f8   : > { %v2805_v58 = vpop.f32.mrf.mxu2 }
 0x1f9   : > { %v2878_v59 = vpack.c.bf16 %v2874_v30, %v2874_v30  ;;  %v2806_v14 = vadd.f32 %v2805_v58, %v6732_v19 }
 0x1fb   : > { %3150 = vmatmul.bf16.vlgmr.msrb.gmra.mxu3 %v2878_v59 }
 0x1fc   : > { %v2716_v0 = vpop.f32.mrf.mxu0 }
 0x200   : > { %v2807_v3 = vpop.f32.mrf.mxu2 }
 0x204   : > { %v2766_v5 = vpop.f32.mrf.mxu0 }
 0x205   : > { %v2767_v46 = vadd.f32 %v2766_v5, %v2754_v60 }
 0x207   : > { %v2875_v8 = vmax.f32 %v2767_v46, 0.0 }
 0x209   : > { %v2879_v9 = vpack.c.bf16 %v2875_v8, %v2875_v8 }
 0x20b   : > { %3163 = vmatmul.bf16.vlgmr.msrb.gmra.mxu1 %v2879_v9 }
 0x20c   : > { %v2768_v11 = vpop.f32.mrf.mxu0 }
 0x214   : > { %v2818_v45 = vpop.f32.mrf.mxu0 }
 0x215   : > { %v2819_v7 = vadd.f32 %v2818_v45, %v2806_v14 }
 0x217   : > { %v2876_v12 = vmax.f32 %v2819_v7, 0.0 }
 0x218   : > { %v2857_v62 = vpop.f32.mrf.mxu2 }
 0x219   : > { %v2880_v17 = vpack.c.bf16 %v2876_v12, %v2876_v12  ;;  %v2858_v21 = vadd.f32 %v2857_v62, %v6735_v15 }
 0x21b   : > { %3176 = vmatmul.bf16.vlgmr.msrb.gmra.mxu2 %v2880_v17 }
 0x21c   : > { %v2820_v18 = vpop.f32.mrf.mxu0 }
 0x220   : > { %v2859_v20 = vpop.f32.mrf.mxu2 }
 0x234   : > { %v2870_v22 = vpop.f32.mrf.mxu0 }
 0x235   : > { %v2871_v23 = vadd.f32 %v2870_v22, %v2858_v21 }
 0x237   : > { %v2877_v34 = vmax.f32 %v2871_v23, 0.0 }
 0x239   : > { %v2881_v26 = vpack.c.bf16 %v2877_v34, %v2877_v34 }
 0x23b   : > { %3189 = vmatmul.bf16.vlgmr.msrb.gmra.mxu0 %v2881_v26 }
 0x23c   : > { %v2872_v19 = vpop.f32.mrf.mxu0 }
 0x27e   : > { %v3151_v27 = vpop.f32.mrf.mxu3 }
 0x27f   : > { %v3152_v33 = vadd.f32 %v5155_v32, %v3151_v27 }
 0x286   : > { %v3153_v51 = vpop.f32.mrf.mxu3 }
 0x288   : > { %v3164_v38 = vpop.f32.mrf.mxu1 }
 0x289   : > { %v3165_v36 = vadd.f32 %v3164_v38, %v3152_v33 }
 0x290   : > { %v3166_v2 = vpop.f32.mrf.mxu1 }
 0x29e   : > { %v3177_v31 = vpop.f32.mrf.mxu2 }
 0x29f   : > { %v3178_v39 = vadd.f32 %v3177_v31, %v3165_v36 }
 0x2a6   : > { %v3179_v29 = vpop.f32.mrf.mxu2 }
 0x2b8   : > { %v3190_v40 = vpop.f32.mrf.mxu0 }
 0x2b9   : > { %v3191_v41 = vadd.f32 %v3190_v40, %v3178_v39 }
 0x2bb   : > { %3194 = vst [vmem:[%s305_s18] sm:$0xff] %v3191_v41 }
 0x2bc   : > { %5243 = shalt.err (!%p5240_p8)
}
 0x2bd   : > { %5099 = dma.vmem_to_hbm [thread:$0]  (%p5372_p5), %s3209_s13, 128, %s3211_s19, %s3196_s20  }
 0x2c0   : > { %v3192_v42 = vpop.f32.mrf.mxu0 }
 0x2c1 PF: > { %p5116_p9 = scmp.ge.s32.totalorder %s5286_s27, 2  ;;  %s3222_s8 = sand.u32 1, %s5274_s24  }
 0x2c2   : > { %s3223_s15 = scalar_lea.sflag [#allocation4], %s3222_s8 }
 0x2c3   : > { %p5109_p10 = pnand %p5116_p9, %p5376_p6 }
 0x2c5   : > { %p5110_p11 = pneg %p5109_p10 }
 0x2c7   : > { %5269 = dma.done.wait (%p5110_p11), %s3223_s15, 128  }
 0x2c8   : > { %5271 = vsyncadd (%p5110_p11), %s3223_s15, 4294967168  ;;  %p19_p12 = scmp.ge.s32.totalorder %s5359_s30, 4   ;;  %s6787_s24 = smov %s5278_s25 }
 0x2c9   : > { %s6788_s25 = smov %s5282_s26  ;;  %s6789_s26 = smov %s5370_s10 }
 0x2ca   : > { %s6790_s27 = smov %s5359_s30  ;;  %21 = sbr.rel (!%p19_p12) target bundleno = 5 (0x5), region = 92 }
 0x2cf   :  { %3229 = vsyncpa [#allocation3], 1 }
 0x2d0   :  { %3231 = vsyncpa [#allocation3 + $0x1], 1 }
 0x2d1   :  { %3232 = vsyncpa [#allocation6], 1 }
 0x2d2   :  { %3233 = vsyncpa [#allocation4], 1 }
 0x2d3   :  { %3235 = vsyncpa [#allocation4 + $0x1], 1 }

</bundles_post_ra>
